<compile_context>
chip_gen: v5e
topology: v5e:2x2
jax: 0.10.0
libtpu: 0.0.40
codegen_flags: <defaults>
</compile_context>

<pallas_src>
import functools
import math

import jax
import jax.numpy as jnp
from jax.experimental import pallas as pl

# ---- small synthetic GPT-2 config ----
VOCAB = 100
MAX_POS = 16
HIDDEN = 32
N_HEAD = 4
HEAD_DIM = HIDDEN // N_HEAD
N_LAYER = 2
FFN = 4 * HIDDEN            # 128 -> exactly one lane tile
N_CLASSES = 2
LN_EPS = 1e-5
NEG_INF = -1e9

# Row layout of the packed per-layer small-tensor slab: (N_LAYER, 8, 128) f32.
ROW_LN1_G, ROW_LN1_B, ROW_B_QKV, ROW_B_PROJ = 0, 1, 2, 3
ROW_LN2_G, ROW_LN2_B, ROW_B_FC, ROW_B_OUT = 4, 5, 6, 7


def _layer_norm(x, g, b, eps=LN_EPS):
    mu = jnp.mean(x, axis=-1, keepdims=True)
    var = jnp.mean(jnp.square(x - mu), axis=-1, keepdims=True)
    return (x - mu) * jax.lax.rsqrt(var + eps) * g + b


def _gelu_new(x):
    # GPT-2 "gelu_new" (tanh approximation)
    c = math.sqrt(2.0 / math.pi)
    return 0.5 * x * (1.0 + jnp.tanh(c * (x + 0.044715 * x * x * x)))


def _gpt2_kernel(mask_ref, x_ref, wqkv_ref, wproj_ref, wfc_ref, wout_ref,
                 small_ref, lnfg_ref, lnfb_ref, wcls_ref, bcls_ref,
                 logits_ref, *, batch, seq, n_head, head_dim, n_layer):
    """Single invocation: whole GPT-2 stack + ln_f + classifier head."""
    hid = n_head * head_dim
    scale = 1.0 / math.sqrt(head_dim)

    # ---- causal + key-padding additive bias, built once from the (B,S) mask,
    # replicated head-major on the leading axis so every head shares one
    # batched contraction.  Fully-padded query rows get a uniform softmax;
    # those rows are discarded by token-0 pooling, so this is benign.
    row = jax.lax.broadcasted_iota(jnp.int32, (batch, seq, seq), 1)
    col = jax.lax.broadcasted_iota(jnp.int32, (batch, seq, seq), 2)
    pad_ok = jax.lax.broadcast_in_dim(mask_ref[...], (batch, seq, seq), (0, 2)) > 0.0
    keep = jnp.logical_and(row >= col, pad_ok)
    bias = jnp.where(keep, 0.0, NEG_INF).astype(jnp.float32)        # (B, S, S)
    bias_hb = jnp.concatenate([bias] * n_head, axis=0)              # (hB, S, S)

    x = x_ref[...]                                                  # (B*S, H)

    for l in range(n_layer):      # static unroll: scheduler sees whole network
        sm = small_ref[l]                                           # (8, 128)
        ln1_g = sm[ROW_LN1_G:ROW_LN1_G + 1, :hid]
        ln1_b = sm[ROW_LN1_B:ROW_LN1_B + 1, :hid]
        b_qkv = sm[ROW_B_QKV:ROW_B_QKV + 1, :3 * hid]
        b_proj = sm[ROW_B_PROJ:ROW_B_PROJ + 1, :hid]
        ln2_g = sm[ROW_LN2_G:ROW_LN2_G + 1, :hid]
        ln2_b = sm[ROW_LN2_B:ROW_LN2_B + 1, :hid]
        b_fc = sm[ROW_B_FC:ROW_B_FC + 1, :]                         # FFN = 128
        b_out = sm[ROW_B_OUT:ROW_B_OUT + 1, :hid]

        # ---- self-attention ----
        h1 = _layer_norm(x, ln1_g, ln1_b)
        qkv = jnp.dot(h1, wqkv_ref[l],
                      preferred_element_type=jnp.float32) + b_qkv   # (B*S, 3H)
        qkv3 = qkv.reshape(batch, seq, 3 * hid)
        # stack heads along the leading (batch) axis -> (n_head*B, S, head_dim)
        q_s = jnp.concatenate(
            [qkv3[:, :, h * head_dim:(h + 1) * head_dim]
             for h in range(n_head)], axis=0)
        k_s = jnp.concatenate(
            [qkv3[:, :, hid + h * head_dim: hid + (h + 1) * head_dim]
             for h in range(n_head)], axis=0)
        v_s = jnp.concatenate(
            [qkv3[:, :, 2 * hid + h * head_dim: 2 * hid + (h + 1) * head_dim]
             for h in range(n_head)], axis=0)

        s = jnp.einsum('bqd,bkd->bqk', q_s, k_s,
                       preferred_element_type=jnp.float32) * scale + bias_hb
        m = jnp.max(s, axis=-1, keepdims=True)
        p = jnp.exp(s - m)
        p = p * pl.reciprocal(jnp.sum(p, axis=-1, keepdims=True), approx=True)
        ctx = jnp.einsum('bqk,bkd->bqd', p, v_s,
                         preferred_element_type=jnp.float32)        # (hB, S, d)

        # merge heads through the output projection (no lane concat):
        # attn = sum_h ctx_h @ Wproj[h*d:(h+1)*d, :]
        ctx_h = ctx.reshape(n_head, batch * seq, head_dim)
        wproj_h = wproj_ref[l].reshape(n_head, head_dim, hid)
        attn = jnp.einsum('hrd,hdo->hro', ctx_h, wproj_h,
                          preferred_element_type=jnp.float32).sum(axis=0) + b_proj
        x = x + attn

        # ---- MLP ----
        h2 = _layer_norm(x, ln2_g, ln2_b)
        f = _gelu_new(jnp.dot(h2, wfc_ref[l],
                              preferred_element_type=jnp.float32) + b_fc)
        x = x + jnp.dot(f, wout_ref[l],
                        preferred_element_type=jnp.float32) + b_out

    # ---- classification head: final LayerNorm on token 0 + Linear -> 2 ----
    pooled = x.reshape(batch, seq, hid)[:, 0:1, :].reshape(batch, hid)  # (B, H)
    hp = _layer_norm(pooled, lnfg_ref[...], lnfb_ref[...])
    # TODO(synk): nn.Dropout(0.3) is identity in eval mode; training-mode
    # stochastic dropout is not applied here.
    logits_ref[...] = (jnp.dot(hp, wcls_ref[...],
                               preferred_element_type=jnp.float32)
                       + bcls_ref[...])


def gpt2_fused_forward(params, x_flat, attention_mask, batch, seq):
    """x_flat: (B*S, H) f32.  attention_mask: (B, S) f32.  Returns (B, 2)."""
    kernel = functools.partial(_gpt2_kernel, batch=batch, seq=seq,
                               n_head=N_HEAD, head_dim=HEAD_DIM,
                               n_layer=N_LAYER)
    # Grid-less call: every operand is small enough to live whole in VMEM, so
    # a single invocation avoids all per-grid-step overhead.
    return pl.pallas_call(
        kernel,
        out_shape=jax.ShapeDtypeStruct((batch, N_CLASSES), jnp.float32),
    )(attention_mask, x_flat,
      params["w_qkv"], params["w_proj"], params["w_fc"], params["w_out"],
      params["layer_small"], params["lnf_g"], params["lnf_b"],
      params["w_cls"], params["b_cls"])


def init_params(key):
    std = 0.02
    keys = jax.random.split(key, 7)

    def nrm(k, shape):
        return std * jax.random.normal(k, shape, jnp.float32)

    # packed per-layer small tensors: one (8, 128) tile per layer
    # rows: ln1_g, ln1_b, b_qkv, b_proj, ln2_g, ln2_b, b_fc, b_out
    small = jnp.zeros((N_LAYER, 8, 128), jnp.float32)
    small = small.at[:, ROW_LN1_G, :HIDDEN].set(1.0)
    small = small.at[:, ROW_LN2_G, :HIDDEN].set(1.0)
    # all biases / LayerNorm betas start at zero

    return {
        "wte": nrm(keys[0], (VOCAB, HIDDEN)),
        "wpe": nrm(keys[1], (MAX_POS, HIDDEN)),
        # per-layer dense weights stacked on a leading layer axis (f32)
        "w_qkv": nrm(keys[2], (N_LAYER, HIDDEN, 3 * HIDDEN)),
        "w_proj": nrm(keys[3], (N_LAYER, HIDDEN, HIDDEN)),
        "w_fc": nrm(keys[4], (N_LAYER, HIDDEN, FFN)),
        "w_out": nrm(keys[5], (N_LAYER, FFN, HIDDEN)),
        "layer_small": small,
        # final ln_f + classifier
        "lnf_g": jnp.ones((1, HIDDEN), jnp.float32),
        "lnf_b": jnp.zeros((1, HIDDEN), jnp.float32),
        "w_cls": nrm(keys[6], (HIDDEN, N_CLASSES)),
        "b_cls": jnp.zeros((1, N_CLASSES), jnp.float32),
    }


def gpt2_for_sentiment(params, input_ids, attention_mask=None, labels=None):
    B, S = input_ids.shape
    if attention_mask is None:
        attention_mask = jnp.ones((B, S), jnp.float32)
    attention_mask = attention_mask.astype(jnp.float32)

    # embeddings (plain-JAX gather glue)
    pos = jnp.arange(S)
    x = params["wte"][input_ids] + params["wpe"][pos][None, :, :]   # (B, S, H)
    x_flat = x.reshape(B * S, HIDDEN).astype(jnp.float32)

    logits = gpt2_fused_forward(params, x_flat, attention_mask, B, S)  # (B, 2)

    if labels is not None:
        logp = jax.nn.log_softmax(logits, axis=-1)
        loss = -jnp.mean(jnp.take_along_axis(logp, labels[:, None], axis=1))
        return loss, logits
    return logits


if __name__ == "__main__":
    key = jax.random.PRNGKey(0)
    pkey, ikey = jax.random.split(key)
    params = init_params(pkey)

    B, S = 2, 8
    input_ids = jax.random.randint(ikey, (B, S), 0, VOCAB, dtype=jnp.int32)
    attention_mask = jnp.array([[1, 1, 1, 1, 1, 1, 1, 1],
                                [1, 1, 1, 1, 1, 1, 0, 0]], jnp.int32)
    labels = jnp.array([0, 1], jnp.int32)

    logits = gpt2_for_sentiment(params, input_ids, attention_mask)          # (B, 2)
    loss, logits2 = gpt2_for_sentiment(params, input_ids, attention_mask, labels)
    jax.block_until_ready((logits, loss, logits2))
    assert logits.shape == (B, N_CLASSES)
    assert bool(jnp.all(jnp.isfinite(logits)))
    assert bool(jnp.isfinite(loss))
    print("KERNEL_OK")
</pallas_src>

<mosaic_0001>
module attributes {stable_mosaic.version = 11 : i64} {
  func.func @_gpt2_kernel(%arg0: memref<2x8xf32, #tpu.memory_space<vmem>>, %arg1: memref<16x32xf32, #tpu.memory_space<vmem>>, %arg2: memref<2x32x96xf32, #tpu.memory_space<vmem>>, %arg3: memref<2x32x32xf32, #tpu.memory_space<vmem>>, %arg4: memref<2x32x128xf32, #tpu.memory_space<vmem>>, %arg5: memref<2x128x32xf32, #tpu.memory_space<vmem>>, %arg6: memref<2x8x128xf32, #tpu.memory_space<vmem>>, %arg7: memref<1x32xf32, #tpu.memory_space<vmem>>, %arg8: memref<1x32xf32, #tpu.memory_space<vmem>>, %arg9: memref<32x2xf32, #tpu.memory_space<vmem>>, %arg10: memref<1x2xf32, #tpu.memory_space<vmem>>, %arg11: memref<2x2xf32, #tpu.memory_space<vmem>>) attributes {dimension_semantics = [], scalar_prefetch = 0 : i64, scratch_operands = 0 : i64, tpu.core_type = #tpu.core_type<tc>} {
    %0 = tpu.iota {dimensions = array<i32: 1>} : vector<2x8x8xi32>
    %1 = tpu.iota {dimensions = array<i32: 2>} : vector<2x8x8xi32>
    %c0 = arith.constant 0 : index
    %c0_0 = arith.constant 0 : index
    %2 = vector.load %arg0[%c0, %c0_0] : memref<2x8xf32, #tpu.memory_space<vmem>>, vector<2x8xf32>
    %3 = vector.shape_cast %2 : vector<2x8xf32> to vector<2x1x8xf32>
    %4 = vector.broadcast %3 : vector<2x1x8xf32> to vector<2x8x8xf32>
    %cst = arith.constant 0.000000e+00 : f32
    %5 = vector.broadcast %cst : f32 to vector<2x8x8xf32>
    %6 = arith.cmpf ogt, %4, %5 : vector<2x8x8xf32>
    %7 = arith.cmpi sge, %0, %1 : vector<2x8x8xi32>
    %8 = arith.andi %7, %6 : vector<2x8x8xi1>
    %cst_1 = arith.constant 0.000000e+00 : f32
    %cst_2 = arith.constant -1.000000e+09 : f32
    %9 = vector.broadcast %cst_1 : f32 to vector<2x8x8xf32>
    %10 = vector.broadcast %cst_2 : f32 to vector<2x8x8xf32>
    %11 = arith.select %8, %9, %10 : vector<2x8x8xi1>, vector<2x8x8xf32>
    %12 = tpu.concatenate %11, %11, %11, %11 in 0 : vector<2x8x8xf32>, vector<2x8x8xf32>, vector<2x8x8xf32>, vector<2x8x8xf32> -> vector<8x8x8xf32>
    %c0_3 = arith.constant 0 : index
    %c0_4 = arith.constant 0 : index
    %13 = vector.load %arg1[%c0_3, %c0_4] : memref<16x32xf32, #tpu.memory_space<vmem>>, vector<16x32xf32>
    %c0_5 = arith.constant 0 : index
    %c0_6 = arith.constant 0 : index
    %c0_7 = arith.constant 0 : index
    %14 = vector.load %arg6[%c0_5, %c0_6, %c0_7] : memref<2x8x128xf32, #tpu.memory_space<vmem>>, vector<1x8x128xf32>
    %15 = vector.shape_cast %14 : vector<1x8x128xf32> to vector<8x128xf32>
    %16 = vector.extract_strided_slice %15 {offsets = [0, 0], sizes = [1, 32], strides = [1, 1]} : vector<8x128xf32> to vector<1x32xf32>
    %17 = vector.extract_strided_slice %15 {offsets = [1, 0], sizes = [1, 32], strides = [1, 1]} : vector<8x128xf32> to vector<1x32xf32>
    %18 = vector.extract_strided_slice %15 {offsets = [2, 0], sizes = [1, 96], strides = [1, 1]} : vector<8x128xf32> to vector<1x96xf32>
    %19 = vector.extract_strided_slice %15 {offsets = [3, 0], sizes = [1, 32], strides = [1, 1]} : vector<8x128xf32> to vector<1x32xf32>
    %20 = vector.extract_strided_slice %15 {offsets = [4, 0], sizes = [1, 32], strides = [1, 1]} : vector<8x128xf32> to vector<1x32xf32>
    %21 = vector.extract_strided_slice %15 {offsets = [5, 0], sizes = [1, 32], strides = [1, 1]} : vector<8x128xf32> to vector<1x32xf32>
    %22 = vector.extract_strided_slice %15 {offsets = [6, 0], sizes = [1, 128], strides = [1, 1]} : vector<8x128xf32> to vector<1x128xf32>
    %23 = vector.extract_strided_slice %15 {offsets = [7, 0], sizes = [1, 32], strides = [1, 1]} : vector<8x128xf32> to vector<1x32xf32>
    %cst_8 = arith.constant dense<0.000000e+00> : vector<16xf32>
    %24 = vector.multi_reduction <add>, %13, %cst_8 [1] : vector<16x32xf32> to vector<16xf32>
    %25 = vector.shape_cast %24 : vector<16xf32> to vector<16x1xf32>
    %cst_9 = arith.constant 3.200000e+01 : f32
    %26 = vector.broadcast %cst_9 : f32 to vector<16x1xf32>
    %27 = arith.divf %25, %26 : vector<16x1xf32>
    %28 = vector.broadcast %27 : vector<16x1xf32> to vector<16x32xf32>
    %29 = arith.subf %13, %28 : vector<16x32xf32>
    %30 = arith.mulf %29, %29 : vector<16x32xf32>
    %cst_10 = arith.constant dense<0.000000e+00> : vector<16xf32>
    %31 = vector.multi_reduction <add>, %30, %cst_10 [1] : vector<16x32xf32> to vector<16xf32>
    %32 = vector.shape_cast %31 : vector<16xf32> to vector<16x1xf32>
    %cst_11 = arith.constant 3.200000e+01 : f32
    %33 = vector.broadcast %cst_11 : f32 to vector<16x1xf32>
    %34 = arith.divf %32, %33 : vector<16x1xf32>
    %35 = vector.broadcast %27 : vector<16x1xf32> to vector<16x32xf32>
    %36 = arith.subf %13, %35 : vector<16x32xf32>
    %cst_12 = arith.constant 9.99999974E-6 : f32
    %37 = vector.broadcast %cst_12 : f32 to vector<16x1xf32>
    %38 = arith.addf %34, %37 : vector<16x1xf32>
    %39 = math.rsqrt %38 : vector<16x1xf32>
    %40 = vector.broadcast %39 : vector<16x1xf32> to vector<16x32xf32>
    %41 = arith.mulf %36, %40 : vector<16x32xf32>
    %42 = vector.broadcast %16 : vector<1x32xf32> to vector<16x32xf32>
    %43 = arith.mulf %41, %42 : vector<16x32xf32>
    %44 = vector.broadcast %17 : vector<1x32xf32> to vector<16x32xf32>
    %45 = arith.addf %43, %44 : vector<16x32xf32>
    %c0_13 = arith.constant 0 : index
    %c0_14 = arith.constant 0 : index
    %c0_15 = arith.constant 0 : index
    %46 = vector.load %arg2[%c0_13, %c0_14, %c0_15] : memref<2x32x96xf32, #tpu.memory_space<vmem>>, vector<1x32x96xf32>
    %47 = vector.shape_cast %46 : vector<1x32x96xf32> to vector<32x96xf32>
    %cst_16 = arith.constant dense<0.000000e+00> : vector<16x96xf32>
    %48 = tpu.matmul %45, %47, %cst_16 {dimension_numbers = #tpu.dot_dimension_numbers<[1], [0], [0], [1], [0, 0, 1, 1], [], []>} : vector<16x32xf32>, vector<32x96xf32>, vector<16x96xf32> -> vector<16x96xf32>
    %49 = vector.broadcast %18 : vector<1x96xf32> to vector<16x96xf32>
    %50 = arith.addf %48, %49 : vector<16x96xf32>
    %51 = vector.shape_cast %50 : vector<16x96xf32> to vector<2x8x96xf32>
    %52 = vector.extract_strided_slice %51 {offsets = [0, 0, 0], sizes = [2, 8, 8], strides = [1, 1, 1]} : vector<2x8x96xf32> to vector<2x8x8xf32>
    %53 = vector.extract_strided_slice %51 {offsets = [0, 0, 8], sizes = [2, 8, 8], strides = [1, 1, 1]} : vector<2x8x96xf32> to vector<2x8x8xf32>
    %54 = vector.extract_strided_slice %51 {offsets = [0, 0, 16], sizes = [2, 8, 8], strides = [1, 1, 1]} : vector<2x8x96xf32> to vector<2x8x8xf32>
    %55 = vector.extract_strided_slice %51 {offsets = [0, 0, 24], sizes = [2, 8, 8], strides = [1, 1, 1]} : vector<2x8x96xf32> to vector<2x8x8xf32>
    %56 = tpu.concatenate %52, %53, %54, %55 in 0 : vector<2x8x8xf32>, vector<2x8x8xf32>, vector<2x8x8xf32>, vector<2x8x8xf32> -> vector<8x8x8xf32>
    %57 = vector.extract_strided_slice %51 {offsets = [0, 0, 32], sizes = [2, 8, 8], strides = [1, 1, 1]} : vector<2x8x96xf32> to vector<2x8x8xf32>
    %58 = vector.extract_strided_slice %51 {offsets = [0, 0, 40], sizes = [2, 8, 8], strides = [1, 1, 1]} : vector<2x8x96xf32> to vector<2x8x8xf32>
    %59 = vector.extract_strided_slice %51 {offsets = [0, 0, 48], sizes = [2, 8, 8], strides = [1, 1, 1]} : vector<2x8x96xf32> to vector<2x8x8xf32>
    %60 = vector.extract_strided_slice %51 {offsets = [0, 0, 56], sizes = [2, 8, 8], strides = [1, 1, 1]} : vector<2x8x96xf32> to vector<2x8x8xf32>
    %61 = tpu.concatenate %57, %58, %59, %60 in 0 : vector<2x8x8xf32>, vector<2x8x8xf32>, vector<2x8x8xf32>, vector<2x8x8xf32> -> vector<8x8x8xf32>
    %62 = vector.extract_strided_slice %51 {offsets = [0, 0, 64], sizes = [2, 8, 8], strides = [1, 1, 1]} : vector<2x8x96xf32> to vector<2x8x8xf32>
    %63 = vector.extract_strided_slice %51 {offsets = [0, 0, 72], sizes = [2, 8, 8], strides = [1, 1, 1]} : vector<2x8x96xf32> to vector<2x8x8xf32>
    %64 = vector.extract_strided_slice %51 {offsets = [0, 0, 80], sizes = [2, 8, 8], strides = [1, 1, 1]} : vector<2x8x96xf32> to vector<2x8x8xf32>
    %65 = vector.extract_strided_slice %51 {offsets = [0, 0, 88], sizes = [2, 8, 8], strides = [1, 1, 1]} : vector<2x8x96xf32> to vector<2x8x8xf32>
    %66 = tpu.concatenate %62, %63, %64, %65 in 0 : vector<2x8x8xf32>, vector<2x8x8xf32>, vector<2x8x8xf32>, vector<2x8x8xf32> -> vector<8x8x8xf32>
    "tpu.trace_start"() <{level = 10 : i32, message = "bqd,bkd->bqk"}> : () -> ()
    %cst_17 = arith.constant dense<0.000000e+00> : vector<8x8x8xf32>
    %67 = tpu.matmul %56, %61, %cst_17 {dimension_numbers = #tpu.dot_dimension_numbers<[2], [2], [1], [1], [0, 0, 0, 1, 1, 1], [0], [0]>} : vector<8x8x8xf32>, vector<8x8x8xf32>, vector<8x8x8xf32> -> vector<8x8x8xf32>
    "tpu.trace_stop"() : () -> ()
    %cst_18 = arith.constant 0.353553385 : f32
    %68 = vector.broadcast %cst_18 : f32 to vector<8x8x8xf32>
    %69 = arith.mulf %67, %68 : vector<8x8x8xf32>
    %70 = arith.addf %69, %12 : vector<8x8x8xf32>
    %cst_19 = arith.constant dense<0xFF800000> : vector<8x8xf32>
    %71 = vector.multi_reduction <maximumf>, %70, %cst_19 [2] : vector<8x8x8xf32> to vector<8x8xf32>
    %72 = vector.shape_cast %71 : vector<8x8xf32> to vector<8x8x1xf32>
    %73 = vector.broadcast %72 : vector<8x8x1xf32> to vector<8x8x8xf32>
    %74 = arith.subf %70, %73 : vector<8x8x8xf32>
    %75 = math.exp %74 : vector<8x8x8xf32>
    %cst_20 = arith.constant dense<0.000000e+00> : vector<8x8xf32>
    %76 = vector.multi_reduction <add>, %75, %cst_20 [2] : vector<8x8x8xf32> to vector<8x8xf32>
    %77 = vector.shape_cast %76 : vector<8x8xf32> to vector<8x8x1xf32>
    %78 = tpu.reciprocal %77 {approx = true} : vector<8x8x1xf32> -> vector<8x8x1xf32>
    %79 = vector.broadcast %78 : vector<8x8x1xf32> to vector<8x8x8xf32>
    %80 = arith.mulf %75, %79 : vector<8x8x8xf32>
    "tpu.trace_start"() <{level = 10 : i32, message = "bqk,bkd->bqd"}> : () -> ()
    %cst_21 = arith.constant dense<0.000000e+00> : vector<8x8x8xf32>
    %81 = tpu.matmul %80, %66, %cst_21 {dimension_numbers = #tpu.dot_dimension_numbers<[2], [1], [1], [2], [0, 0, 0, 1, 1, 2], [0], [0]>} : vector<8x8x8xf32>, vector<8x8x8xf32>, vector<8x8x8xf32> -> vector<8x8x8xf32>
    "tpu.trace_stop"() : () -> ()
    %82 = vector.shape_cast %81 : vector<8x8x8xf32> to vector<4x16x8xf32>
    %c0_22 = arith.constant 0 : index
    %c0_23 = arith.constant 0 : index
    %c0_24 = arith.constant 0 : index
    %83 = vector.load %arg3[%c0_22, %c0_23, %c0_24] : memref<2x32x32xf32, #tpu.memory_space<vmem>>, vector<1x32x32xf32>
    %84 = vector.shape_cast %83 : vector<1x32x32xf32> to vector<32x32xf32>
    %85 = vector.shape_cast %84 : vector<32x32xf32> to vector<4x8x32xf32>
    "tpu.trace_start"() <{level = 10 : i32, message = "hrd,hdo->hro"}> : () -> ()
    %cst_25 = arith.constant dense<0.000000e+00> : vector<4x16x32xf32>
    %86 = tpu.matmul %82, %85, %cst_25 {dimension_numbers = #tpu.dot_dimension_numbers<[2], [1], [1], [2], [0, 0, 0, 1, 1, 2], [0], [0]>} : vector<4x16x8xf32>, vector<4x8x32xf32>, vector<4x16x32xf32> -> vector<4x16x32xf32>
    "tpu.trace_stop"() : () -> ()
    %cst_26 = arith.constant dense<0.000000e+00> : vector<16x32xf32>
    %87 = vector.multi_reduction <add>, %86, %cst_26 [0] : vector<4x16x32xf32> to vector<16x32xf32>
    %88 = vector.broadcast %19 : vector<1x32xf32> to vector<16x32xf32>
    %89 = arith.addf %87, %88 : vector<16x32xf32>
    %90 = arith.addf %13, %89 : vector<16x32xf32>
    %cst_27 = arith.constant dense<0.000000e+00> : vector<16xf32>
    %91 = vector.multi_reduction <add>, %90, %cst_27 [1] : vector<16x32xf32> to vector<16xf32>
    %92 = vector.shape_cast %91 : vector<16xf32> to vector<16x1xf32>
    %cst_28 = arith.constant 3.200000e+01 : f32
    %93 = vector.broadcast %cst_28 : f32 to vector<16x1xf32>
    %94 = arith.divf %92, %93 : vector<16x1xf32>
    %95 = vector.broadcast %94 : vector<16x1xf32> to vector<16x32xf32>
    %96 = arith.subf %90, %95 : vector<16x32xf32>
    %97 = arith.mulf %96, %96 : vector<16x32xf32>
    %cst_29 = arith.constant dense<0.000000e+00> : vector<16xf32>
    %98 = vector.multi_reduction <add>, %97, %cst_29 [1] : vector<16x32xf32> to vector<16xf32>
    %99 = vector.shape_cast %98 : vector<16xf32> to vector<16x1xf32>
    %cst_30 = arith.constant 3.200000e+01 : f32
    %100 = vector.broadcast %cst_30 : f32 to vector<16x1xf32>
    %101 = arith.divf %99, %100 : vector<16x1xf32>
    %102 = vector.broadcast %94 : vector<16x1xf32> to vector<16x32xf32>
    %103 = arith.subf %90, %102 : vector<16x32xf32>
    %cst_31 = arith.constant 9.99999974E-6 : f32
    %104 = vector.broadcast %cst_31 : f32 to vector<16x1xf32>
    %105 = arith.addf %101, %104 : vector<16x1xf32>
    %106 = math.rsqrt %105 : vector<16x1xf32>
    %107 = vector.broadcast %106 : vector<16x1xf32> to vector<16x32xf32>
    %108 = arith.mulf %103, %107 : vector<16x32xf32>
    %109 = vector.broadcast %20 : vector<1x32xf32> to vector<16x32xf32>
    %110 = arith.mulf %108, %109 : vector<16x32xf32>
    %111 = vector.broadcast %21 : vector<1x32xf32> to vector<16x32xf32>
    %112 = arith.addf %110, %111 : vector<16x32xf32>
    %c0_32 = arith.constant 0 : index
    %c0_33 = arith.constant 0 : index
    %c0_34 = arith.constant 0 : index
    %113 = vector.load %arg4[%c0_32, %c0_33, %c0_34] : memref<2x32x128xf32, #tpu.memory_space<vmem>>, vector<1x32x128xf32>
    %114 = vector.shape_cast %113 : vector<1x32x128xf32> to vector<32x128xf32>
    %cst_35 = arith.constant dense<0.000000e+00> : vector<16x128xf32>
    %115 = tpu.matmul %112, %114, %cst_35 {dimension_numbers = #tpu.dot_dimension_numbers<[1], [0], [0], [1], [0, 0, 1, 1], [], []>} : vector<16x32xf32>, vector<32x128xf32>, vector<16x128xf32> -> vector<16x128xf32>
    %116 = vector.broadcast %22 : vector<1x128xf32> to vector<16x128xf32>
    %117 = arith.addf %115, %116 : vector<16x128xf32>
    %cst_36 = arith.constant 5.000000e-01 : f32
    %118 = vector.broadcast %cst_36 : f32 to vector<16x128xf32>
    %119 = arith.mulf %118, %117 : vector<16x128xf32>
    %cst_37 = arith.constant 4.471500e-02 : f32
    %120 = vector.broadcast %cst_37 : f32 to vector<16x128xf32>
    %121 = arith.mulf %120, %117 : vector<16x128xf32>
    %122 = arith.mulf %121, %117 : vector<16x128xf32>
    %123 = arith.mulf %122, %117 : vector<16x128xf32>
    %124 = arith.addf %117, %123 : vector<16x128xf32>
    %cst_38 = arith.constant 0.797884583 : f32
    %125 = vector.broadcast %cst_38 : f32 to vector<16x128xf32>
    %126 = arith.mulf %125, %124 : vector<16x128xf32>
    %127 = math.tanh %126 : vector<16x128xf32>
    %cst_39 = arith.constant 1.000000e+00 : f32
    %128 = vector.broadcast %cst_39 : f32 to vector<16x128xf32>
    %129 = arith.addf %128, %127 : vector<16x128xf32>
    %130 = arith.mulf %119, %129 : vector<16x128xf32>
    %c0_40 = arith.constant 0 : index
    %c0_41 = arith.constant 0 : index
    %c0_42 = arith.constant 0 : index
    %131 = vector.load %arg5[%c0_40, %c0_41, %c0_42] : memref<2x128x32xf32, #tpu.memory_space<vmem>>, vector<1x128x32xf32>
    %132 = vector.shape_cast %131 : vector<1x128x32xf32> to vector<128x32xf32>
    %cst_43 = arith.constant dense<0.000000e+00> : vector<16x32xf32>
    %133 = tpu.matmul %130, %132, %cst_43 {dimension_numbers = #tpu.dot_dimension_numbers<[1], [0], [0], [1], [0, 0, 1, 1], [], []>} : vector<16x128xf32>, vector<128x32xf32>, vector<16x32xf32> -> vector<16x32xf32>
    %134 = arith.addf %90, %133 : vector<16x32xf32>
    %135 = vector.broadcast %23 : vector<1x32xf32> to vector<16x32xf32>
    %136 = arith.addf %134, %135 : vector<16x32xf32>
    %c1 = arith.constant 1 : index
    %c0_44 = arith.constant 0 : index
    %c0_45 = arith.constant 0 : index
    %137 = vector.load %arg6[%c1, %c0_44, %c0_45] : memref<2x8x128xf32, #tpu.memory_space<vmem>>, vector<1x8x128xf32>
    %138 = vector.shape_cast %137 : vector<1x8x128xf32> to vector<8x128xf32>
    %139 = vector.extract_strided_slice %138 {offsets = [0, 0], sizes = [1, 32], strides = [1, 1]} : vector<8x128xf32> to vector<1x32xf32>
    %140 = vector.extract_strided_slice %138 {offsets = [1, 0], sizes = [1, 32], strides = [1, 1]} : vector<8x128xf32> to vector<1x32xf32>
    %141 = vector.extract_strided_slice %138 {offsets = [2, 0], sizes = [1, 96], strides = [1, 1]} : vector<8x128xf32> to vector<1x96xf32>
    %142 = vector.extract_strided_slice %138 {offsets = [3, 0], sizes = [1, 32], strides = [1, 1]} : vector<8x128xf32> to vector<1x32xf32>
    %143 = vector.extract_strided_slice %138 {offsets = [4, 0], sizes = [1, 32], strides = [1, 1]} : vector<8x128xf32> to vector<1x32xf32>
    %144 = vector.extract_strided_slice %138 {offsets = [5, 0], sizes = [1, 32], strides = [1, 1]} : vector<8x128xf32> to vector<1x32xf32>
    %145 = vector.extract_strided_slice %138 {offsets = [6, 0], sizes = [1, 128], strides = [1, 1]} : vector<8x128xf32> to vector<1x128xf32>
    %146 = vector.extract_strided_slice %138 {offsets = [7, 0], sizes = [1, 32], strides = [1, 1]} : vector<8x128xf32> to vector<1x32xf32>
    %cst_46 = arith.constant dense<0.000000e+00> : vector<16xf32>
    %147 = vector.multi_reduction <add>, %136, %cst_46 [1] : vector<16x32xf32> to vector<16xf32>
    %148 = vector.shape_cast %147 : vector<16xf32> to vector<16x1xf32>
    %cst_47 = arith.constant 3.200000e+01 : f32
    %149 = vector.broadcast %cst_47 : f32 to vector<16x1xf32>
    %150 = arith.divf %148, %149 : vector<16x1xf32>
    %151 = vector.broadcast %150 : vector<16x1xf32> to vector<16x32xf32>
    %152 = arith.subf %136, %151 : vector<16x32xf32>
    %153 = arith.mulf %152, %152 : vector<16x32xf32>
    %cst_48 = arith.constant dense<0.000000e+00> : vector<16xf32>
    %154 = vector.multi_reduction <add>, %153, %cst_48 [1] : vector<16x32xf32> to vector<16xf32>
    %155 = vector.shape_cast %154 : vector<16xf32> to vector<16x1xf32>
    %cst_49 = arith.constant 3.200000e+01 : f32
    %156 = vector.broadcast %cst_49 : f32 to vector<16x1xf32>
    %157 = arith.divf %155, %156 : vector<16x1xf32>
    %158 = vector.broadcast %150 : vector<16x1xf32> to vector<16x32xf32>
    %159 = arith.subf %136, %158 : vector<16x32xf32>
    %cst_50 = arith.constant 9.99999974E-6 : f32
    %160 = vector.broadcast %cst_50 : f32 to vector<16x1xf32>
    %161 = arith.addf %157, %160 : vector<16x1xf32>
    %162 = math.rsqrt %161 : vector<16x1xf32>
    %163 = vector.broadcast %162 : vector<16x1xf32> to vector<16x32xf32>
    %164 = arith.mulf %159, %163 : vector<16x32xf32>
    %165 = vector.broadcast %139 : vector<1x32xf32> to vector<16x32xf32>
    %166 = arith.mulf %164, %165 : vector<16x32xf32>
    %167 = vector.broadcast %140 : vector<1x32xf32> to vector<16x32xf32>
    %168 = arith.addf %166, %167 : vector<16x32xf32>
    %c1_51 = arith.constant 1 : index
    %c0_52 = arith.constant 0 : index
    %c0_53 = arith.constant 0 : index
    %169 = vector.load %arg2[%c1_51, %c0_52, %c0_53] : memref<2x32x96xf32, #tpu.memory_space<vmem>>, vector<1x32x96xf32>
    %170 = vector.shape_cast %169 : vector<1x32x96xf32> to vector<32x96xf32>
    %cst_54 = arith.constant dense<0.000000e+00> : vector<16x96xf32>
    %171 = tpu.matmul %168, %170, %cst_54 {dimension_numbers = #tpu.dot_dimension_numbers<[1], [0], [0], [1], [0, 0, 1, 1], [], []>} : vector<16x32xf32>, vector<32x96xf32>, vector<16x96xf32> -> vector<16x96xf32>
    %172 = vector.broadcast %141 : vector<1x96xf32> to vector<16x96xf32>
    %173 = arith.addf %171, %172 : vector<16x96xf32>
    %174 = vector.shape_cast %173 : vector<16x96xf32> to vector<2x8x96xf32>
    %175 = vector.extract_strided_slice %174 {offsets = [0, 0, 0], sizes = [2, 8, 8], strides = [1, 1, 1]} : vector<2x8x96xf32> to vector<2x8x8xf32>
    %176 = vector.extract_strided_slice %174 {offsets = [0, 0, 8], sizes = [2, 8, 8], strides = [1, 1, 1]} : vector<2x8x96xf32> to vector<2x8x8xf32>
    %177 = vector.extract_strided_slice %174 {offsets = [0, 0, 16], sizes = [2, 8, 8], strides = [1, 1, 1]} : vector<2x8x96xf32> to vector<2x8x8xf32>
    %178 = vector.extract_strided_slice %174 {offsets = [0, 0, 24], sizes = [2, 8, 8], strides = [1, 1, 1]} : vector<2x8x96xf32> to vector<2x8x8xf32>
    %179 = tpu.concatenate %175, %176, %177, %178 in 0 : vector<2x8x8xf32>, vector<2x8x8xf32>, vector<2x8x8xf32>, vector<2x8x8xf32> -> vector<8x8x8xf32>
    %180 = vector.extract_strided_slice %174 {offsets = [0, 0, 32], sizes = [2, 8, 8], strides = [1, 1, 1]} : vector<2x8x96xf32> to vector<2x8x8xf32>
    %181 = vector.extract_strided_slice %174 {offsets = [0, 0, 40], sizes = [2, 8, 8], strides = [1, 1, 1]} : vector<2x8x96xf32> to vector<2x8x8xf32>
    %182 = vector.extract_strided_slice %174 {offsets = [0, 0, 48], sizes = [2, 8, 8], strides = [1, 1, 1]} : vector<2x8x96xf32> to vector<2x8x8xf32>
    %183 = vector.extract_strided_slice %174 {offsets = [0, 0, 56], sizes = [2, 8, 8], strides = [1, 1, 1]} : vector<2x8x96xf32> to vector<2x8x8xf32>
    %184 = tpu.concatenate %180, %181, %182, %183 in 0 : vector<2x8x8xf32>, vector<2x8x8xf32>, vector<2x8x8xf32>, vector<2x8x8xf32> -> vector<8x8x8xf32>
    %185 = vector.extract_strided_slice %174 {offsets = [0, 0, 64], sizes = [2, 8, 8], strides = [1, 1, 1]} : vector<2x8x96xf32> to vector<2x8x8xf32>
    %186 = vector.extract_strided_slice %174 {offsets = [0, 0, 72], sizes = [2, 8, 8], strides = [1, 1, 1]} : vector<2x8x96xf32> to vector<2x8x8xf32>
    %187 = vector.extract_strided_slice %174 {offsets = [0, 0, 80], sizes = [2, 8, 8], strides = [1, 1, 1]} : vector<2x8x96xf32> to vector<2x8x8xf32>
    %188 = vector.extract_strided_slice %174 {offsets = [0, 0, 88], sizes = [2, 8, 8], strides = [1, 1, 1]} : vector<2x8x96xf32> to vector<2x8x8xf32>
    %189 = tpu.concatenate %185, %186, %187, %188 in 0 : vector<2x8x8xf32>, vector<2x8x8xf32>, vector<2x8x8xf32>, vector<2x8x8xf32> -> vector<8x8x8xf32>
    "tpu.trace_start"() <{level = 10 : i32, message = "bqd,bkd->bqk"}> : () -> ()
    %cst_55 = arith.constant dense<0.000000e+00> : vector<8x8x8xf32>
    %190 = tpu.matmul %179, %184, %cst_55 {dimension_numbers = #tpu.dot_dimension_numbers<[2], [2], [1], [1], [0, 0, 0, 1, 1, 1], [0], [0]>} : vector<8x8x8xf32>, vector<8x8x8xf32>, vector<8x8x8xf32> -> vector<8x8x8xf32>
    "tpu.trace_stop"() : () -> ()
    %cst_56 = arith.constant 0.353553385 : f32
    %191 = vector.broadcast %cst_56 : f32 to vector<8x8x8xf32>
    %192 = arith.mulf %190, %191 : vector<8x8x8xf32>
    %193 = arith.addf %192, %12 : vector<8x8x8xf32>
    %cst_57 = arith.constant dense<0xFF800000> : vector<8x8xf32>
    %194 = vector.multi_reduction <maximumf>, %193, %cst_57 [2] : vector<8x8x8xf32> to vector<8x8xf32>
    %195 = vector.shape_cast %194 : vector<8x8xf32> to vector<8x8x1xf32>
    %196 = vector.broadcast %195 : vector<8x8x1xf32> to vector<8x8x8xf32>
    %197 = arith.subf %193, %196 : vector<8x8x8xf32>
    %198 = math.exp %197 : vector<8x8x8xf32>
    %cst_58 = arith.constant dense<0.000000e+00> : vector<8x8xf32>
    %199 = vector.multi_reduction <add>, %198, %cst_58 [2] : vector<8x8x8xf32> to vector<8x8xf32>
    %200 = vector.shape_cast %199 : vector<8x8xf32> to vector<8x8x1xf32>
    %201 = tpu.reciprocal %200 {approx = true} : vector<8x8x1xf32> -> vector<8x8x1xf32>
    %202 = vector.broadcast %201 : vector<8x8x1xf32> to vector<8x8x8xf32>
    %203 = arith.mulf %198, %202 : vector<8x8x8xf32>
    "tpu.trace_start"() <{level = 10 : i32, message = "bqk,bkd->bqd"}> : () -> ()
    %cst_59 = arith.constant dense<0.000000e+00> : vector<8x8x8xf32>
    %204 = tpu.matmul %203, %189, %cst_59 {dimension_numbers = #tpu.dot_dimension_numbers<[2], [1], [1], [2], [0, 0, 0, 1, 1, 2], [0], [0]>} : vector<8x8x8xf32>, vector<8x8x8xf32>, vector<8x8x8xf32> -> vector<8x8x8xf32>
    "tpu.trace_stop"() : () -> ()
    %205 = vector.shape_cast %204 : vector<8x8x8xf32> to vector<4x16x8xf32>
    %c1_60 = arith.constant 1 : index
    %c0_61 = arith.constant 0 : index
    %c0_62 = arith.constant 0 : index
    %206 = vector.load %arg3[%c1_60, %c0_61, %c0_62] : memref<2x32x32xf32, #tpu.memory_space<vmem>>, vector<1x32x32xf32>
    %207 = vector.shape_cast %206 : vector<1x32x32xf32> to vector<32x32xf32>
    %208 = vector.shape_cast %207 : vector<32x32xf32> to vector<4x8x32xf32>
    "tpu.trace_start"() <{level = 10 : i32, message = "hrd,hdo->hro"}> : () -> ()
    %cst_63 = arith.constant dense<0.000000e+00> : vector<4x16x32xf32>
    %209 = tpu.matmul %205, %208, %cst_63 {dimension_numbers = #tpu.dot_dimension_numbers<[2], [1], [1], [2], [0, 0, 0, 1, 1, 2], [0], [0]>} : vector<4x16x8xf32>, vector<4x8x32xf32>, vector<4x16x32xf32> -> vector<4x16x32xf32>
    "tpu.trace_stop"() : () -> ()
    %cst_64 = arith.constant dense<0.000000e+00> : vector<16x32xf32>
    %210 = vector.multi_reduction <add>, %209, %cst_64 [0] : vector<4x16x32xf32> to vector<16x32xf32>
    %211 = vector.broadcast %142 : vector<1x32xf32> to vector<16x32xf32>
    %212 = arith.addf %210, %211 : vector<16x32xf32>
    %213 = arith.addf %136, %212 : vector<16x32xf32>
    %cst_65 = arith.constant dense<0.000000e+00> : vector<16xf32>
    %214 = vector.multi_reduction <add>, %213, %cst_65 [1] : vector<16x32xf32> to vector<16xf32>
    %215 = vector.shape_cast %214 : vector<16xf32> to vector<16x1xf32>
    %cst_66 = arith.constant 3.200000e+01 : f32
    %216 = vector.broadcast %cst_66 : f32 to vector<16x1xf32>
    %217 = arith.divf %215, %216 : vector<16x1xf32>
    %218 = vector.broadcast %217 : vector<16x1xf32> to vector<16x32xf32>
    %219 = arith.subf %213, %218 : vector<16x32xf32>
    %220 = arith.mulf %219, %219 : vector<16x32xf32>
    %cst_67 = arith.constant dense<0.000000e+00> : vector<16xf32>
    %221 = vector.multi_reduction <add>, %220, %cst_67 [1] : vector<16x32xf32> to vector<16xf32>
    %222 = vector.shape_cast %221 : vector<16xf32> to vector<16x1xf32>
    %cst_68 = arith.constant 3.200000e+01 : f32
    %223 = vector.broadcast %cst_68 : f32 to vector<16x1xf32>
    %224 = arith.divf %222, %223 : vector<16x1xf32>
    %225 = vector.broadcast %217 : vector<16x1xf32> to vector<16x32xf32>
    %226 = arith.subf %213, %225 : vector<16x32xf32>
    %cst_69 = arith.constant 9.99999974E-6 : f32
    %227 = vector.broadcast %cst_69 : f32 to vector<16x1xf32>
    %228 = arith.addf %224, %227 : vector<16x1xf32>
    %229 = math.rsqrt %228 : vector<16x1xf32>
    %230 = vector.broadcast %229 : vector<16x1xf32> to vector<16x32xf32>
    %231 = arith.mulf %226, %230 : vector<16x32xf32>
    %232 = vector.broadcast %143 : vector<1x32xf32> to vector<16x32xf32>
    %233 = arith.mulf %231, %232 : vector<16x32xf32>
    %234 = vector.broadcast %144 : vector<1x32xf32> to vector<16x32xf32>
    %235 = arith.addf %233, %234 : vector<16x32xf32>
    %c1_70 = arith.constant 1 : index
    %c0_71 = arith.constant 0 : index
    %c0_72 = arith.constant 0 : index
    %236 = vector.load %arg4[%c1_70, %c0_71, %c0_72] : memref<2x32x128xf32, #tpu.memory_space<vmem>>, vector<1x32x128xf32>
    %237 = vector.shape_cast %236 : vector<1x32x128xf32> to vector<32x128xf32>
    %cst_73 = arith.constant dense<0.000000e+00> : vector<16x128xf32>
    %238 = tpu.matmul %235, %237, %cst_73 {dimension_numbers = #tpu.dot_dimension_numbers<[1], [0], [0], [1], [0, 0, 1, 1], [], []>} : vector<16x32xf32>, vector<32x128xf32>, vector<16x128xf32> -> vector<16x128xf32>
    %239 = vector.broadcast %145 : vector<1x128xf32> to vector<16x128xf32>
    %240 = arith.addf %238, %239 : vector<16x128xf32>
    %cst_74 = arith.constant 5.000000e-01 : f32
    %241 = vector.broadcast %cst_74 : f32 to vector<16x128xf32>
    %242 = arith.mulf %241, %240 : vector<16x128xf32>
    %cst_75 = arith.constant 4.471500e-02 : f32
    %243 = vector.broadcast %cst_75 : f32 to vector<16x128xf32>
    %244 = arith.mulf %243, %240 : vector<16x128xf32>
    %245 = arith.mulf %244, %240 : vector<16x128xf32>
    %246 = arith.mulf %245, %240 : vector<16x128xf32>
    %247 = arith.addf %240, %246 : vector<16x128xf32>
    %cst_76 = arith.constant 0.797884583 : f32
    %248 = vector.broadcast %cst_76 : f32 to vector<16x128xf32>
    %249 = arith.mulf %248, %247 : vector<16x128xf32>
    %250 = math.tanh %249 : vector<16x128xf32>
    %cst_77 = arith.constant 1.000000e+00 : f32
    %251 = vector.broadcast %cst_77 : f32 to vector<16x128xf32>
    %252 = arith.addf %251, %250 : vector<16x128xf32>
    %253 = arith.mulf %242, %252 : vector<16x128xf32>
    %c1_78 = arith.constant 1 : index
    %c0_79 = arith.constant 0 : index
    %c0_80 = arith.constant 0 : index
    %254 = vector.load %arg5[%c1_78, %c0_79, %c0_80] : memref<2x128x32xf32, #tpu.memory_space<vmem>>, vector<1x128x32xf32>
    %255 = vector.shape_cast %254 : vector<1x128x32xf32> to vector<128x32xf32>
    %cst_81 = arith.constant dense<0.000000e+00> : vector<16x32xf32>
    %256 = tpu.matmul %253, %255, %cst_81 {dimension_numbers = #tpu.dot_dimension_numbers<[1], [0], [0], [1], [0, 0, 1, 1], [], []>} : vector<16x128xf32>, vector<128x32xf32>, vector<16x32xf32> -> vector<16x32xf32>
    %257 = arith.addf %213, %256 : vector<16x32xf32>
    %258 = vector.broadcast %146 : vector<1x32xf32> to vector<16x32xf32>
    %259 = arith.addf %257, %258 : vector<16x32xf32>
    %260 = vector.shape_cast %259 : vector<16x32xf32> to vector<2x8x32xf32>
    %261 = vector.extract_strided_slice %260 {offsets = [0, 0, 0], sizes = [2, 1, 32], strides = [1, 1, 1]} : vector<2x8x32xf32> to vector<2x1x32xf32>
    %262 = vector.shape_cast %261 : vector<2x1x32xf32> to vector<2x32xf32>
    %c0_82 = arith.constant 0 : index
    %c0_83 = arith.constant 0 : index
    %263 = vector.load %arg7[%c0_82, %c0_83] : memref<1x32xf32, #tpu.memory_space<vmem>>, vector<1x32xf32>
    %c0_84 = arith.constant 0 : index
    %c0_85 = arith.constant 0 : index
    %264 = vector.load %arg8[%c0_84, %c0_85] : memref<1x32xf32, #tpu.memory_space<vmem>>, vector<1x32xf32>
    %cst_86 = arith.constant dense<0.000000e+00> : vector<2xf32>
    %265 = vector.multi_reduction <add>, %262, %cst_86 [1] : vector<2x32xf32> to vector<2xf32>
    %266 = vector.shape_cast %265 : vector<2xf32> to vector<2x1xf32>
    %cst_87 = arith.constant 3.200000e+01 : f32
    %267 = vector.broadcast %cst_87 : f32 to vector<2x1xf32>
    %268 = arith.divf %266, %267 : vector<2x1xf32>
    %269 = vector.broadcast %268 : vector<2x1xf32> to vector<2x32xf32>
    %270 = arith.subf %262, %269 : vector<2x32xf32>
    %271 = arith.mulf %270, %270 : vector<2x32xf32>
    %cst_88 = arith.constant dense<0.000000e+00> : vector<2xf32>
    %272 = vector.multi_reduction <add>, %271, %cst_88 [1] : vector<2x32xf32> to vector<2xf32>
    %273 = vector.shape_cast %272 : vector<2xf32> to vector<2x1xf32>
    %cst_89 = arith.constant 3.200000e+01 : f32
    %274 = vector.broadcast %cst_89 : f32 to vector<2x1xf32>
    %275 = arith.divf %273, %274 : vector<2x1xf32>
    %276 = vector.broadcast %268 : vector<2x1xf32> to vector<2x32xf32>
    %277 = arith.subf %262, %276 : vector<2x32xf32>
    %cst_90 = arith.constant 9.99999974E-6 : f32
    %278 = vector.broadcast %cst_90 : f32 to vector<2x1xf32>
    %279 = arith.addf %275, %278 : vector<2x1xf32>
    %280 = math.rsqrt %279 : vector<2x1xf32>
    %281 = vector.broadcast %280 : vector<2x1xf32> to vector<2x32xf32>
    %282 = arith.mulf %277, %281 : vector<2x32xf32>
    %283 = vector.broadcast %263 : vector<1x32xf32> to vector<2x32xf32>
    %284 = arith.mulf %282, %283 : vector<2x32xf32>
    %285 = vector.broadcast %264 : vector<1x32xf32> to vector<2x32xf32>
    %286 = arith.addf %284, %285 : vector<2x32xf32>
    %c0_91 = arith.constant 0 : index
    %c0_92 = arith.constant 0 : index
    %287 = vector.load %arg9[%c0_91, %c0_92] : memref<32x2xf32, #tpu.memory_space<vmem>>, vector<32x2xf32>
    %cst_93 = arith.constant dense<0.000000e+00> : vector<2x2xf32>
    %288 = tpu.matmul %286, %287, %cst_93 {dimension_numbers = #tpu.dot_dimension_numbers<[1], [0], [0], [1], [0, 0, 1, 1], [], []>} : vector<2x32xf32>, vector<32x2xf32>, vector<2x2xf32> -> vector<2x2xf32>
    %c0_94 = arith.constant 0 : index
    %c0_95 = arith.constant 0 : index
    %289 = vector.load %arg10[%c0_94, %c0_95] : memref<1x2xf32, #tpu.memory_space<vmem>>, vector<1x2xf32>
    %290 = vector.broadcast %289 : vector<1x2xf32> to vector<2x2xf32>
    %291 = arith.addf %288, %290 : vector<2x2xf32>
    %c0_96 = arith.constant 0 : index
    %c0_97 = arith.constant 0 : index
    %292 = vector.load %arg11[%c0_96, %c0_97] : memref<2x2xf32, #tpu.memory_space<vmem>>, vector<2x2xf32>
    tpu.vector_store %arg11[%c0_96, %c0_97], %291 {strides = array<i32>} : memref<2x2xf32, #tpu.memory_space<vmem>>, vector<2x2xf32>,
    return
  }
}

</mosaic_0001>

<bundles_post_ra>
// kernel: tpu_custom_call.1
= control target key start
LH: loop header
LB: loop body
LE: loop exit
PB: predicated region body
PF: predicated region fallthrough
CT: control target
= control target key end

     0   :  { %vm60_vm0 = vcmask 261120   ;;  %s2928_s0 = inlined_call_operand.vmem [shape: f32[2,8], index: 0, kind: input, shape index: {}]   ;;  %s2929_s1 = inlined_call_operand.vmem [shape: f32[16,32], index: 1, kind: input, shape index: {}]   ;;  %s2930_s2 = inlined_call_operand.vmem [shape: f32[2,32,96], index: 2, kind: input, shape index: {}]   ;;  %s2931_s3 = inlined_call_operand.vmem [shape: f32[2,32,32], index: 3, kind: input, shape index: {}]   ;;  %s2932_s4 = inlined_call_operand.vmem [shape: f32[2,32,128], index: 4, kind: input, shape index: {}]   ;;  %s2933_s5 = inlined_call_operand.vmem [shape: f32[2,128,32], index: 5, kind: input, shape index: {}]   ;;  %s2934_s6 = inlined_call_operand.vmem [shape: f32[2,8,128], index: 6, kind: input, shape index: {}]   ;;  %s2935_s7 = inlined_call_operand.vmem [shape: f32[1,32], index: 7, kind: input, shape index: {}]   ;;  %s2936_s8 = inlined_call_operand.vmem [shape: f32[1,32], index: 8, kind: input, shape index: {}]   ;;  %s2937_s9 = inlined_call_operand.vmem [shape: f32[32,2], index: 9, kind: input, shape index: {}]   ;;  %s2938_s10 = inlined_call_operand.vmem [shape: f32[1,2], index: 10, kind: input, shape index: {}]   ;;  %s2939_s11 = inlined_call_operand.hbm [shape: f32[2,2], index: 11, kind: output, shape index: {}]  }
   0x1   :  { %v2322_v0 = vld [vmem:[%s2929_s1] sm:$0xff] }
   0x2   :  { %v61_v1 = vsel %vm60_vm0, %v2322_v0, 0.0 }
   0x3   :  { %62 = vadd.xlane.f32.xlu0 %v61_v1 }
   0x4   :  { %16 = vsyncpa [#allocation3], 0  ;;  %v2329_v2 = vld [vmem:[%s2929_s1 + $0x8] sm:$0xff]  ;;  %v2251_v4 = vmov 32.0   ;;  %v121_v21 = vld [vmem:[%s2930_s2 + $0x18] sm:$0xff]  ;;  %s2252_s30 = smov 120  }
   0x5   :  { %v64_v3 = vsel %vm60_vm0, %v2329_v2, 0.0  ;;  %2133 = vrcp.f32 %v2251_v4  ;;  %141 = vmatpush.msra.mxu2 %v121_v21  ;;  %v120_v22 = vld [vmem:[%s2930_s2 + $0x10] sm:$0xff]  ;;  %v119_v23 = vld [vmem:[%s2930_s2 + $0x8] sm:$0xff]  ;;  %v118_v24 = vld [vmem:[%s2930_s2] sm:$0xff]  ;;  %s2253_s12 = smov 112   ;;  %s2254_s13 = smov 104  }
   0x6   :  { %v2358_v36 = vld [vmem:[%s2934_s6] sm:$0xff]  ;;  %s2255_s14 = smov 96   ;;  %vm168_vm8 = vcmask 64512   ;;  %s1981_s16 = sshll.u32 %s2939_s11, 4  ;;  %s1982_s16 = int_to_ptr.hbm [resolvable:$true] %s1981_s16 }
   0x7   :  { %142 = vmatpush.msra.mxu2 %v120_v22  ;;  %v112_v40 = vperm.slane %v2358_v36, 0  ;;  %v115_v44 = vperm.slane %v2358_v36, 1  ;;  %v122_v54 = vperm.slane %v2358_v36, 2 }
   0x9   :  { %143 = vmatpush.msra.mxu2 %v119_v23 }
   0xb   :  { %65 = vadd.xlane.f32.xlu0 %v64_v3  ;;  %v2134_v5 = vpop.eup %2133  ;;  %144 = vmatpush.msra.mxu2 %v118_v24 }
   0xc   :  { %v68_v6 = vmul.f32 32.0, %v2134_v5  ;;  %vm72_vm1 = vweird.f32 %v2134_v5 }
   0xe   :  { %v69_v7 = vsub.f32 1.0, %v68_v6 }
  0x10   :  { %v70_v8 = vmul.f32 %v2134_v5, %v69_v7 }
  0x12   :  { %v71_v9 = vadd.f32 %v2134_v5, %v70_v8 }
  0x14   :  { %v2333_v10 = vsel %vm72_vm1, %v2134_v5, %v71_v9 }
  0x76   :  { %v63_v11 = vpop.xlane.xlu0 %62 }
  0x77   :  { %v74_v12 = vmul.f32 %v2333_v10, %v63_v11  ;;  %v43_v11 = vld [vmem:[%s2928_s0] sm:$0x3]  ;;  %s2257_s0 = smov 64  }
  0x79   :  { %v76_v13 = vsub.f32 %v2322_v0, %v74_v12  ;;  %v39_v12 = vlaneseq }
  0x7b   :  { %v78_v14 = vmul.f32 %v76_v13, %v76_v13 }
  0x7d   :  { %v80_v15 = vsel %vm60_vm0, %v78_v14, 0.0 }
  0x7e   :  { %81 = vadd.xlane.f32.xlu1 %v80_v15  ;;  %v66_v16 = vpop.xlane.xlu0 %65  ;;  %v40_v15 = vshrl.u32 %v39_v12, 7 }
  0x7f   :  { %v75_v17 = vmul.f32 %v2333_v10, %v66_v16  ;;  %v42_v16 = vand.u32 127, %v39_v12 }
  0x81   :  { %v77_v18 = vsub.f32 %v2329_v2, %v75_v17  ;;  %vm52_vm10 = vcmp.ge.s32.totalorder %v40_v15, %v42_v16 }
  0x83   :  { %v79_v19 = vmul.f32 %v77_v18, %v77_v18 }
  0x85   :  { %v83_v20 = vsel %vm60_vm0, %v79_v19, 0.0 }
  0x86   :  { %84 = vadd.xlane.f32.xlu1 %v83_v20  ;;  %v2256_v20 = vmov -1e+09  }
  0xf1   :  { %v82_v25 = vpop.xlane.xlu1 %81 }
  0xf2   :  { %v86_v26 = vmul.f32 %v82_v25, %v2333_v10 }
  0xf4   :  { %v88_v27 = vadd.f32 1e-05, %v86_v26 }
  0xf6   :  { %2135 = vrsqrt.f32 %v88_v27  ;;  %vm96_vm3 = vweird.f32 %v88_v27 }
  0xf9   :  { %v85_v28 = vpop.xlane.xlu1 %84 }
  0xfa   :  { %v87_v29 = vmul.f32 %v85_v28, %v2333_v10 }
  0xfc   :  { %v2136_v30 = vpop.eup %2135  ;;  %v89_v31 = vadd.f32 1e-05, %v87_v29 }
  0xfd   :  { %v91_v32 = vmul.f32 %v2136_v30, %v88_v27  ;;  %vm97_vm2 = vweird.f32 %v2136_v30 }
  0xfe   :  { %2137 = vrsqrt.f32 %v89_v31  ;;  %vm98_vm4 = vmor %vm96_vm3, %vm97_vm2  ;;  %vm106_vm6 = vweird.f32 %v89_v31 }
  0xff   :  { %v92_v33 = vmul.f32 %v2136_v30, %v91_v32 }
 0x101   :  { %v93_v34 = vmul.f32 0.5, %v92_v33 }
 0x103   :  { %v94_v35 = vsub.f32 1.5, %v93_v34 }
 0x104   :  { %v2138_v37 = vpop.eup %2137 }
 0x105   :  { %v95_v38 = vmul.f32 %v2136_v30, %v94_v35  ;;  %v101_v39 = vmul.f32 %v2138_v37, %v89_v31  ;;  %vm107_vm5 = vweird.f32 %v2138_v37 }
 0x106   :  { %vm108_vm7 = vmor %vm106_vm6, %vm107_vm5 }
 0x107   :  { %v99_v41 = vsel %vm98_vm4, %v2136_v30, %v95_v38  ;;  %v102_v42 = vmul.f32 %v2138_v37, %v101_v39 }
 0x108   :  { %v110_v43 = vmul.f32 %v99_v41, %v76_v13  ;;  %v45_v13 = vrot.slane %v43_v11, 1 }
 0x109   :  { %v103_v45 = vmul.f32 0.5, %v102_v42 }
 0x10a   :  { %v113_v46 = vmul.f32 %v112_v40, %v110_v43  ;;  %v47_v17 = vperm.slane %v45_v13, 0 }
 0x10b   :  { %v104_v47 = vsub.f32 1.5, %v103_v45 }
 0x10c   :  { %v116_v48 = vadd.f32 %v115_v44, %v113_v46  ;;  %vm51_vm9 = vcmp.gt.f32.partialorder %v47_v17, 0.0 }
 0x10d   :  { %v105_v49 = vmul.f32 %v2138_v37, %v104_v47  ;;  %vm54_vm11 = vmand %vm52_vm10, %vm51_vm9 }
 0x10e   :  { %1990 = vmatmul.msk.f32.vlgmr.msra.gmra.mxu2 %vm60_vm0, %v116_v48  ;;  %v2436_v21 = vsel %vm54_vm11, 0.0, %v2256_v20 }
 0x10f   :  { %v109_v50 = vsel %vm108_vm7, %v2138_v37, %v105_v49 }
 0x110   :  { %v111_v51 = vmul.f32 %v109_v50, %v77_v18  ;;  %v46_v18 = vperm.slane %v43_v11, 0 }
 0x112   :  { %v114_v52 = vmul.f32 %v112_v40, %v111_v51  ;;  %vm50_vm12 = vcmp.gt.f32.partialorder %v46_v18, 0.0 }
 0x113   :  { %vm53_vm13 = vmand %vm52_vm10, %vm50_vm12 }
 0x114   :  { %v117_v53 = vadd.f32 %v115_v44, %v114_v52  ;;  %v2439_v25 = vsel %vm53_vm13, 0.0, %v2256_v20 }
 0x116   :  { %1991 = vmatmul.msk.f32.gmra.mxu2 %vm60_vm0, %v117_v53 }
 0x191   :  { %v146_v55 = vpop.f32.mrf.mxu2 }
 0x192   :  { %v2365_v56 = vadd.f32 %v146_v55, %v122_v54 }
 0x194   :  { %154 = vrot.lane.b32.xlu2 %v2365_v56, %s2252_s30 }
 0x199   :  { %v149_v57 = vpop.f32.mrf.mxu2 }
 0x19a   :  { %v2369_v58 = vadd.f32 %v149_v57, %v122_v54 }
 0x19c   :  { %158 = vrot.lane.b32.xlu2 %v2365_v56, %s2253_s12  ;;  %164 = vrot.lane.b32.xlu1 %v2369_v58, %s2254_s13 }
 0x19d   :  { %156 = vrot.lane.b32.xlu0 %v2369_v58, %s2252_s30 }
 0x1a4   :  { %162 = vrot.lane.b32.xlu2 %v2365_v56, %s2254_s13 }
 0x1a5   :  { %166 = vrot.lane.b32.xlu0 %v2365_v56, %s2255_s14 }
 0x1ac   :  { %160 = vrot.lane.b32.xlu2 %v2369_v58, %s2253_s12 }
 0x1b4   :  { %193 = vrot.lane.b32.xlu2 %v2369_v58, %s2255_s14 }
 0x1ee   :  { %v2385_v59 = vpop.permute.xlu2 %154 }
 0x1ef   :  { %219 = vrot.lane.b32.xlu2 %v2385_v59, %s2255_s14  ;;  %v2100_v20 = vpack.i.bf16 %v2385_v59, %v2365_v56 }
 0x1f6   :  { %v2389_v60 = vpop.permute.xlu2 %158 }
 0x1f7   :  { %271 = vrot.lane.b32.xlu1 %v2389_v60, %s2255_s14  ;;  %v2105_v12 = vpack.i.bf16 %v2389_v60, %v2369_v58 }
 0x1fe   :  { %v2393_v61 = vpop.permute.xlu2 %162 }
 0x1ff   :  { %323 = vrot.lane.b32.xlu1 %v2393_v61, %s2255_s14 }
 0x206   :  { %v2397_v62 = vpop.permute.xlu2 %160 }
 0x20e   :  { %v194_v63 = vpop.permute.xlu2 %193  ;;  %v2399_v1 = vpop.permute.xlu1 %164 }
 0x20f   :  { %v2401_v3 = vpop.permute.xlu0 %156  ;;  %1994 = vmatpush.xpose.msk.msrb.mxu2 %vm168_vm8, %v194_v63  ;;  %349 = vrot.lane.b32.xlu2 %v2399_v1, %s2255_s14 }
 0x210   :  { %245 = vrot.lane.b32.xlu0 %v2401_v3, %s2255_s14 }
 0x212   :  { %1995 = vmatmul.msk.f32.vlgmr.msrb.gmra.mxu2 %vm168_vm8, %v2369_v58 }
 0x217   :  { %v167_v4 = vpop.permute.xlu0 %166 }
 0x218   :  { %297 = vrot.lane.b32.xlu0 %v2397_v62, %s2255_s14  ;;  %1992 = vmatpush.xpose.msk.msra.mxu1 %vm168_vm8, %v167_v4 }
 0x21b   :  { %1993 = vmatmul.msk.f32.vlgmr.msra.gmra.mxu1 %vm168_vm8, %v2365_v56 }
 0x249   :  { %v220_v5 = vpop.permute.xlu2 %219 }
 0x24a   :  { %1996 = vmatpush.xpose.msk.msra.mxu3 %vm168_vm8, %v220_v5 }
 0x24d   :  { %1997 = vmatmul.msk.f32.vlgmr.msra.gmra.mxu3 %vm168_vm8, %v2385_v59 }
 0x269   :  { %v350_v6 = vpop.permute.xlu2 %349  ;;  %v272_v7 = vpop.permute.xlu1 %271 }
 0x26a   :  { %2000 = vmatpush.xpose.msk.msra.mxu2 %vm168_vm8, %v272_v7 }
 0x26d   :  { %2001 = vmatmul.msk.f32.vlgmr.msra.gmra.mxu2 %vm168_vm8, %v2389_v60 }
 0x26e   :  { %2006 = vmatpush.xpose.msk.msrb.mxu2 %vm168_vm8, %v350_v6 }
 0x271   :  { %v324_v9 = vpop.permute.xlu1 %323 }
 0x275   :  { %2007 = vmatmul.msk.f32.vlgmr.msrb.gmra.mxu2 %vm168_vm8, %v2399_v1 }
 0x282   :  { %v246_v8 = vpop.permute.xlu0 %245 }
 0x283   :  { %1998 = vmatpush.xpose.msk.msrb.mxu1 %vm168_vm8, %v246_v8 }
 0x286   :  { %1999 = vmatmul.msk.f32.vlgmr.msrb.gmra.mxu1 %vm168_vm8, %v2401_v3 }
 0x287   :  { %2004 = vmatpush.xpose.msk.msra.mxu1 %vm168_vm8, %v324_v9 }
 0x28a   :  { %v298_v14 = vpop.permute.xlu0 %297 }
 0x28b   :  { %2002 = vmatpush.xpose.msk.msrb.mxu3 %vm168_vm8, %v298_v14 }
 0x28e   :  { %2003 = vmatmul.msk.f32.vlgmr.msrb.gmra.mxu3 %vm168_vm8, %v2397_v62  ;;  %2005 = vmatmul.msk.f32.vlgmr.msra.gmra.mxu1 %vm168_vm8, %v2393_v61 }
 0x295   :  { %v216_v19 = vpop.f32.mrf.mxu2 }
 0x296   :  { %v376_v22 = vmul.f32 0.35355338, %v216_v19 }
 0x298   :  { %v190_v23 = vpop.f32.mrf.mxu1  ;;  %v384_v24 = vadd.f32 %v376_v22, %v2436_v21 }
 0x299   :  { %v375_v26 = vmul.f32 0.35355338, %v190_v23 }
 0x29a   :  { %v394_v27 = vsel %vm168_vm8, %v384_v24, -inf }
 0x29b   :  { %395 = vmax.xlane.f32.xlu0 %v394_v27  ;;  %v383_v28 = vadd.f32 %v375_v26, %v2439_v25 }
 0x29d   :  { %v391_v29 = vsel %vm168_vm8, %v383_v28, -inf }
 0x29e   :  { %392 = vmax.xlane.f32.xlu2 %v391_v29 }
 0x2d0   :  { %v242_v30 = vpop.f32.mrf.mxu3 }
 0x2d1   :  { %v377_v31 = vmul.f32 0.35355338, %v242_v30 }
 0x2d3   :  { %v385_v32 = vadd.f32 %v377_v31, %v2439_v25 }
 0x2d5   :  { %v397_v33 = vsel %vm168_vm8, %v385_v32, -inf }
 0x2d6   :  { %398 = vmax.xlane.f32.xlu1 %v397_v33 }
 0x2f0   :  { %v294_v34 = vpop.f32.mrf.mxu2 }
 0x2f1   :  { %v379_v35 = vmul.f32 0.35355338, %v294_v34 }
 0x2f3   :  { %v387_v37 = vadd.f32 %v379_v35, %v2439_v25 }
 0x2f5   :  { %v403_v38 = vsel %vm168_vm8, %v387_v37, -inf }
 0x2f6   :  { %404 = vmax.xlane.f32.xlu2 %v403_v38 }
 0x2f8   :  { %v372_v55 = vpop.f32.mrf.mxu2 }
 0x2f9   :  { %v382_v4 = vmul.f32 0.35355338, %v372_v55 }
 0x2fb   :  { %v390_v7 = vadd.f32 %v382_v4, %v2436_v21 }
 0x2fd   :  { %v412_v9 = vsel %vm168_vm8, %v390_v7, -inf }
 0x303   :  { %v268_v39 = vpop.f32.mrf.mxu1 }
 0x304   :  { %v378_v40 = vmul.f32 0.35355338, %v268_v39 }
 0x306   :  { %v386_v41 = vadd.f32 %v378_v40, %v2436_v21 }
 0x308   :  { %v400_v42 = vsel %vm168_vm8, %v386_v41, -inf }
 0x309   :  { %401 = vmax.xlane.f32.xlu2 %v400_v42 }
 0x30b   :  { %v346_v48 = vpop.f32.mrf.mxu1 }
 0x30c   :  { %v381_v52 = vmul.f32 0.35355338, %v346_v48 }
 0x30e   :  { %v396_v45 = vpop.xlane.xlu0 %395  ;;  %v389_v57 = vadd.f32 %v381_v52, %v2439_v25 }
 0x30f   :  { %v416_v51 = vsub.f32 %v384_v24, %v396_v45 }
 0x310   :  { %v409_v6 = vsel %vm168_vm8, %v389_v57, -inf }
 0x311   :  { %v320_v43 = vpop.f32.mrf.mxu3  ;;  %v393_v44 = vpop.xlane.xlu2 %392  ;;  %v425_v54 = vmul.f32 1.442695, %v416_v51 }
 0x312   :  { %v380_v46 = vmul.f32 0.35355338, %v320_v43  ;;  %v415_v47 = vsub.f32 %v383_v28, %v393_v44 }
 0x314   :  { %v423_v49 = vmul.f32 1.442695, %v415_v47  ;;  %v388_v50 = vadd.f32 %v380_v46, %v2436_v21 }
 0x316   :  { %2139 = vpow2.f32 %v423_v49  ;;  %v406_v53 = vsel %vm168_vm8, %v388_v50, -inf  ;;  %v2110_v49 = vpack.i.bf16 %v2399_v1, %v2393_v61 }
 0x317   :  { %407 = vmax.xlane.f32.xlu1 %v406_v53  ;;  %2141 = vpow2.f32 %v425_v54 }
 0x31c   :  { %v2453_v63 = vpop.eup %2139 }
 0x31d   :  { %v439_v5 = vsel %vm168_vm8, %v2453_v63, 0.0  ;;  %v2142_v8 = vpop.eup %2141 }
 0x31e   :  { %440 = vadd.xlane.f32.xlu0 %v439_v5  ;;  %v442_v11 = vsel %vm168_vm8, %v2142_v8, 0.0 }
 0x31f   :  { %410 = vmax.xlane.f32.xlu1 %v409_v6 }
 0x326   :  { %413 = vmax.xlane.f32.xlu0 %v412_v9 }
 0x327   :  { %443 = vadd.xlane.f32.xlu1 %v442_v11 }
 0x33a   :  { %2106 = vrot.lane.b32.xlu0 %v2105_v12, %s2257_s0 }
 0x349   :  { %v399_v13 = vpop.xlane.xlu1 %398 }
 0x34a   :  { %v417_v14 = vsub.f32 %v385_v32, %v399_v13 }
 0x34c   :  { %v427_v15 = vmul.f32 1.442695, %v417_v14 }
 0x34e   :  { %2143 = vpow2.f32 %v427_v15 }
 0x354   :  { %v2144_v16 = vpop.eup %2143 }
 0x355   :  { %v445_v17 = vsel %vm168_vm8, %v2144_v16, 0.0 }
 0x356   :  { %446 = vadd.xlane.f32.xlu2 %v445_v17 }
 0x369   :  { %v405_v18 = vpop.xlane.xlu2 %404 }
 0x36a   :  { %v419_v19 = vsub.f32 %v387_v37, %v405_v18 }
 0x36c   :  { %v431_v22 = vmul.f32 1.442695, %v419_v19 }
 0x36e   :  { %2145 = vpow2.f32 %v431_v22  ;;  %2101 = vrot.lane.b32.xlu2 %v2100_v20, %s2257_s0 }
 0x374   :  { %v2468_v58 = vpop.eup %2145 }
 0x375   :  { %v451_v60 = vsel %vm168_vm8, %v2468_v58, 0.0 }
 0x376   :  { %452 = vadd.xlane.f32.xlu0 %v451_v60  ;;  %v687_v60 = vld [vmem:[%s2931_s3] sm:$0xff] }
 0x37c   :  { %v402_v23 = vpop.xlane.xlu2 %401 }
 0x37d   :  { %v418_v24 = vsub.f32 %v386_v41, %v402_v23 }
 0x37f   :  { %v429_v26 = vmul.f32 1.442695, %v418_v24  ;;  %v689_v24 = vld [vmem:[%s2931_s3 + $0x10] sm:$0xff] }
 0x381   :  { %2147 = vpow2.f32 %v429_v26 }
 0x387   :  { %v2472_v27 = vpop.eup %2147 }
 0x388   :  { %v448_v28 = vsel %vm168_vm8, %v2472_v27, 0.0 }
 0x389   :  { %449 = vadd.xlane.f32.xlu1 %v448_v28 }
 0x38a   :  { %v408_v56 = vpop.xlane.xlu1 %407 }
 0x38b   :  { %v420_v59 = vsub.f32 %v388_v50, %v408_v56  ;;  %v690_v56 = vld [vmem:[%s2931_s3 + $0x18] sm:$0xff] }
 0x38d   :  { %v433_v29 = vmul.f32 1.442695, %v420_v59 }
 0x38f   :  { %2149 = vpow2.f32 %v433_v29 }
 0x391   :  { %v441_v30 = vpop.xlane.xlu0 %440 }
 0x392   :  { %v411_v31 = vpop.xlane.xlu1 %410 }
 0x393   :  { %v421_v32 = vsub.f32 %v389_v57, %v411_v31 }
 0x395   :  { %v2476_v33 = vpop.eup %2149  ;;  %v435_v34 = vmul.f32 1.442695, %v421_v32 }
 0x396   :  { %v454_v35 = vsel %vm168_vm8, %v2476_v33, 0.0 }
 0x397   :  { %2151 = vpow2.f32 %v435_v34  ;;  %455 = vadd.xlane.f32.xlu2 %v454_v35 }
 0x399   :  { %v414_v37 = vpop.xlane.xlu0 %413 }
 0x39a   :  { %v422_v38 = vsub.f32 %v390_v7, %v414_v37  ;;  %v444_v42 = vpop.xlane.xlu1 %443 }
 0x39c   :  { %v437_v39 = vmul.f32 1.442695, %v422_v38 }
 0x39d   :  { %v2152_v40 = vpop.eup %2151 }
 0x39e   :  { %2153 = vpow2.f32 %v437_v39  ;;  %v457_v41 = vsel %vm168_vm8, %v2152_v40, 0.0 }
 0x39f   :  { %458 = vadd.xlane.f32.xlu1 %v457_v41  ;;  %2155 = vrcp.f32 %v444_v42 }
 0x3a0   :  { %2157 = vrcp.f32 %v441_v30 }
 0x3a4   :  { %v2154_v43 = vpop.eup %2153 }
 0x3a5   :  { %v460_v44 = vsel %vm168_vm8, %v2154_v43, 0.0  ;;  %v2156_v45 = vpop.eup %2155 }
 0x3a6   :  { %461 = vadd.xlane.f32.xlu0 %v460_v44  ;;  %v472_v48 = vmul.f32 %v2156_v45, %v2142_v8  ;;  %v2158_v51 = vpop.eup %2157 }
 0x3a7   :  { %v471_v57 = vmul.f32 %v2158_v51, %v2453_v63 }
 0x3ac   :  { %v2107_v46 = vpop.permute.xlu0 %2106 }
 0x3ad   :  { %v2108_v47 = vunpack.i.l.bf16 %v2107_v46  ;;  %v2109_v61 = vunpack.i.h.bf16 %v2107_v46 }
 0x3af   :  { %526 = vmatpush.msra.mxu0 %v2108_v47 }
 0x3b0   :  { %2009 = vmatmul.msk.f32.vlgmr.msra.gmra.mxu0 %vm168_vm8, %v472_v48 }
 0x3b8   :  { %2111 = vrot.lane.b32.xlu1 %v2110_v49, %s2257_s0 }
 0x3ba   :  { %557 = vrot.lane.b32.xlu0 %v2401_v3, %s2257_s0 }
 0x3c2   :  { %609 = vrot.lane.b32.xlu0 %v2397_v62, %s2257_s0 }
 0x3c9   :  { %v447_v50 = vpop.xlane.xlu2 %446 }
 0x3ca   :  { %2159 = vrcp.f32 %v447_v50 }
 0x3d0   :  { %v2160_v52 = vpop.eup %2159 }
 0x3d1   :  { %v2102_v53 = vpop.permute.xlu2 %2101  ;;  %v473_v4 = vmul.f32 %v2160_v52, %v2144_v16 }
 0x3d2   :  { %v2104_v54 = vunpack.i.h.bf16 %v2102_v53  ;;  %v2103_v55 = vunpack.i.l.bf16 %v2102_v53 }
 0x3d4   :  { %500 = vmatpush.msra.mxu3 %v2103_v55  ;;  %552 = vmatpush.msrb.mxu1 %v2104_v54 }
 0x3d5   :  { %2008 = vmatmul.msk.f32.vlgmr.msra.gmra.mxu3 %vm168_vm8, %v471_v57  ;;  %2010 = vmatmul.msk.f32.vlgmr.msrb.gmra.mxu1 %vm168_vm8, %v473_v4 }
 0x3d6   :  { %604 = vmatpush.msrb.mxu3 %v2109_v61 }
 0x3d8   :  { %712 = vmatpush.msra.mxu3 %v687_v60 }
 0x3e9   :  { %v453_v62 = vpop.xlane.xlu0 %452 }
 0x3ea   :  { %2161 = vrcp.f32 %v453_v62 }
 0x3f0   :  { %v2162_v1 = vpop.eup %2161 }
 0x3f1   :  { %v475_v3 = vmul.f32 %v2162_v1, %v2468_v58  ;;  %v688_v58 = vld [vmem:[%s2931_s3 + $0x8] sm:$0xff] }
 0x3f3   :  { %2012 = vmatmul.msk.f32.vlgmr.msrb.gmra.mxu3 %vm168_vm8, %v475_v3 }
 0x3fc   :  { %v450_v5 = vpop.xlane.xlu1 %449 }
 0x3fd   :  { %2163 = vrcp.f32 %v450_v5 }
 0x403   :  { %v2164_v63 = vpop.eup %2163 }
 0x404   :  { %v474_v16 = vmul.f32 %v2164_v63, %v2472_v27 }
 0x40a   :  { %v456_v8 = vpop.xlane.xlu2 %455 }
 0x412   :  { %v459_v6 = vpop.xlane.xlu1 %458 }
 0x413   :  { %2165 = vrcp.f32 %v459_v6 }
 0x419   :  { %v462_v7 = vpop.xlane.xlu0 %461  ;;  %v2166_v9 = vpop.eup %2165 }
 0x41a   :  { %2167 = vrcp.f32 %v462_v7  ;;  %v477_v17 = vmul.f32 %v2166_v9, %v2152_v40 }
 0x41b   :  { %2169 = vrcp.f32 %v456_v8 }
 0x420   :  { %v2168_v11 = vpop.eup %2167 }
 0x421   :  { %v478_v18 = vmul.f32 %v2168_v11, %v2154_v43  ;;  %v2170_v19 = vpop.eup %2169  ;;  %v821_v43 = vperm.slane %v2358_v36, 3 }
 0x422   :  { %v476_v20 = vmul.f32 %v2170_v19, %v2476_v33 }
 0x42a   :  { %v2112_v12 = vpop.permute.xlu1 %2111 }
 0x42b   :  { %v2114_v13 = vunpack.i.h.bf16 %v2112_v12  ;;  %v2113_v14 = vunpack.i.l.bf16 %v2112_v12 }
 0x42c   :  { %v558_v15 = vpop.permute.xlu0 %557 }
 0x42d   :  { %578 = vmatpush.msrb.mxu0 %v558_v15  ;;  %656 = vmatpush.msra.mxu1 %v2113_v14  ;;  %v528_v27 = vpop.f32.mrf.mxu0  ;;  %v878_v14 = vld [vmem:[%s2932_s4 + $0x10] sm:$0xff]  ;;  %v877_v15 = vld [vmem:[%s2932_s4 + $0x8] sm:$0xff] }
 0x42e   :  { %682 = vmatpush.msra.mxu2 %v2114_v13  ;;  %2011 = vmatmul.msk.f32.vlgmr.msrb.gmra.mxu0 %vm168_vm8, %v474_v16  ;;  %v879_v13 = vld [vmem:[%s2932_s4 + $0x18] sm:$0xff]  ;;  %v876_v16 = vld [vmem:[%s2932_s4] sm:$0xff] }
 0x42f   :  { %2014 = vmatmul.msk.f32.vlgmr.msra.gmra.mxu1 %vm168_vm8, %v477_v17  ;;  %2015 = vmatmul.msk.f32.vlgmr.msra.gmra.mxu2 %vm168_vm8, %v478_v18 }
 0x430   :  { %770 = vmatpush.msrb.mxu1 %v689_v24  ;;  %799 = vmatpush.msrb.mxu2 %v690_v56  ;;  %v940_v24 = vld [vmem:[%s2933_s5 + $0x60] sm:$0xff] }
 0x431   :  { %899 = vmatpush.msrb.mxu3 %v879_v13 }
 0x433   :  { %900 = vmatpush.msrb.mxu3 %v878_v14 }
 0x434   :  { %v610_v22 = vpop.permute.xlu0 %609 }
 0x435   :  { %630 = vmatpush.msra.mxu0 %v610_v22  ;;  %901 = vmatpush.msrb.mxu3 %v877_v15  ;;  %v942_v22 = vld [vmem:[%s2933_s5 + $0x70] sm:$0xff] }
 0x436   :  { %2013 = vmatmul.msk.f32.vlgmr.msra.gmra.mxu0 %vm168_vm8, %v476_v20  ;;  %v943_v20 = vld [vmem:[%s2933_s5 + $0x78] sm:$0xff] }
 0x437   :  { %741 = vmatpush.msrb.mxu0 %v688_v58  ;;  %902 = vmatpush.msrb.mxu3 %v876_v16  ;;  %v941_v58 = vld [vmem:[%s2933_s5 + $0x68] sm:$0xff] }
 0x439   :  { %944 = vmatpush.msra.mxu0 %v943_v20 }
 0x43b   :  { %945 = vmatpush.msra.mxu0 %v942_v22 }
 0x43d   :  { %946 = vmatpush.msra.mxu0 %v941_v58 }
 0x43f   :  { %947 = vmatpush.msra.mxu0 %v940_v24 }
 0x452   :  { %v554_v23 = vpop.f32.mrf.mxu1 }
 0x453   :  { %2018 = vmatmul.msk.f32.vlgmr.msrb.gmra.mxu0 %vm168_vm8, %v554_v23 }
 0x458   :  { %v502_v26 = vpop.f32.mrf.mxu3 }
 0x459   :  { %2016 = vmatmul.msk.f32.vlgmr.msra.gmra.mxu3 %vm168_vm8, %v502_v26 }
 0x461   :  { %2017 = vmatmul.msk.f32.gmra.mxu3 %vm168_vm8, %v528_v27 }
 0x476   :  { %v606_v28 = vpop.f32.mrf.mxu3 }
 0x477   :  { %2020 = vmatmul.msk.f32.vlgmr.msrb.gmra.mxu1 %vm168_vm8, %v606_v28 }
 0x4ab   :  { %v580_v59 = vpop.f32.mrf.mxu0 }
 0x4ac   :  { %v658_v29 = vpop.f32.mrf.mxu1  ;;  %2019 = vmatmul.msk.f32.gmra.mxu0 %vm168_vm8, %v580_v59 }
 0x4ad   :  { %2022 = vmatmul.msk.f32.vlgmr.msrb.gmra.mxu2 %vm168_vm8, %v658_v29 }
 0x4b2   :  { %v684_v31 = vpop.f32.mrf.mxu2 }
 0x4b3   :  { %v632_v30 = vpop.f32.mrf.mxu0 }
 0x4b4   :  { %2021 = vmatmul.msk.f32.gmra.mxu1 %vm168_vm8, %v632_v30 }
 0x4b5   :  { %2023 = vmatmul.msk.f32.gmra.mxu2 %vm168_vm8, %v684_v31 }
 0x4d0   :  { %v743_v32 = vpop.f32.mrf.mxu0 }
 0x4d1   :  { %v808_v37 = vsel %vm60_vm0, %v743_v32, 0.0 }
 0x4dc   :  { %v714_v33 = vpop.f32.mrf.mxu3 }
 0x4dd   :  { %v807_v35 = vsel %vm60_vm0, %v714_v33, 0.0  ;;  %v870_v33 = vperm.slane %v2358_v36, 4 }
 0x4de   :  { %v809_v39 = vadd.f32 %v808_v37, %v807_v35 }
 0x4e4   :  { %v717_v45 = vpop.f32.mrf.mxu3 }
 0x4e5   :  { %v814_v50 = vsel %vm60_vm0, %v717_v45, 0.0 }
 0x4f4   :  { %v772_v34 = vpop.f32.mrf.mxu1 }
 0x4f5   :  { %v810_v38 = vsel %vm60_vm0, %v772_v34, 0.0 }
 0x4f6   :  { %v811_v40 = vadd.f32 %v810_v38, %v809_v39  ;;  %v873_v38 = vperm.slane %v2358_v36, 5 }
 0x529   :  { %v746_v41 = vpop.f32.mrf.mxu0 }
 0x52a   :  { %v815_v48 = vsel %vm60_vm0, %v746_v41, 0.0 }
 0x52b   :  { %v816_v52 = vadd.f32 %v815_v48, %v814_v50  ;;  %v939_v48 = vld [vmem:[%s2933_s5 + $0x58] sm:$0xff]  ;;  %v937_v50 = vld [vmem:[%s2933_s5 + $0x48] sm:$0xff] }
 0x52c   :  { %948 = vmatpush.msra.mxu0 %v939_v48 }
 0x530   :  { %v801_v42 = vpop.f32.mrf.mxu2 }
 0x531   :  { %v812_v44 = vsel %vm60_vm0, %v801_v42, 0.0  ;;  %v775_v47 = vpop.f32.mrf.mxu1 }
 0x532   :  { %v813_v46 = vadd.f32 %v812_v44, %v811_v40  ;;  %v817_v51 = vsel %vm60_vm0, %v775_v47, 0.0 }
 0x533   :  { %v818_v54 = vadd.f32 %v817_v51, %v816_v52  ;;  %v936_v51 = vld [vmem:[%s2933_s5 + $0x40] sm:$0xff]  ;;  %v935_v52 = vld [vmem:[%s2933_s5 + $0x38] sm:$0xff] }
 0x534   :  { %v822_v49 = vadd.f32 %v821_v43, %v813_v46 }
 0x536   :  { %v2530_v53 = vadd.f32 %v822_v49, %v2322_v0  ;;  %v938_v49 = vld [vmem:[%s2933_s5 + $0x50] sm:$0xff] }
 0x537   :  { %949 = vmatpush.msra.mxu0 %v938_v49 }
 0x538   :  { %v804_v55 = vpop.f32.mrf.mxu2  ;;  %v826_v57 = vsel %vm60_vm0, %v2530_v53, 0.0 }
 0x539   :  { %v819_v4 = vsel %vm60_vm0, %v804_v55, 0.0  ;;  %827 = vadd.xlane.f32.xlu1 %v826_v57  ;;  %950 = vmatpush.msra.mxu0 %v937_v50  ;;  %v933_v55 = vld [vmem:[%s2933_s5 + $0x28] sm:$0xff]  ;;  %v932_v57 = vld [vmem:[%s2933_s5 + $0x20] sm:$0xff] }
 0x53a   :  { %v820_v61 = vadd.f32 %v819_v4, %v818_v54  ;;  %v934_v54 = vld [vmem:[%s2933_s5 + $0x30] sm:$0xff]  ;;  %v931_v4 = vld [vmem:[%s2933_s5 + $0x18] sm:$0xff] }
 0x53b   :  { %951 = vmatpush.msra.mxu0 %v936_v51 }
 0x53c   :  { %v823_v62 = vadd.f32 %v821_v43, %v820_v61  ;;  %v930_v61 = vld [vmem:[%s2933_s5 + $0x10] sm:$0xff] }
 0x53d   :  { %952 = vmatpush.msra.mxu0 %v935_v52 }
 0x53e   :  { %v2536_v1 = vadd.f32 %v823_v62, %v2329_v2  ;;  %v929_v62 = vld [vmem:[%s2933_s5 + $0x8] sm:$0xff] }
 0x53f   :  { %953 = vmatpush.msra.mxu0 %v934_v54 }
 0x540   :  { %v829_v3 = vsel %vm60_vm0, %v2536_v1, 0.0 }
 0x541   :  { %830 = vadd.xlane.f32.xlu0 %v829_v3  ;;  %954 = vmatpush.msra.mxu0 %v933_v55  ;;  %v928_v3 = vld [vmem:[%s2933_s5] sm:$0xff] }
 0x543   :  { %955 = vmatpush.msra.mxu0 %v932_v57  ;;  %v2647_v57 = vld [vmem:[%s2934_s6 + $0x8] sm:$0xff] }
 0x545   :  { %956 = vmatpush.msra.mxu0 %v931_v4 }
 0x547   :  { %957 = vmatpush.msra.mxu0 %v930_v61 }
 0x549   :  { %958 = vmatpush.msra.mxu0 %v929_v62 }
 0x54b   :  { %959 = vmatpush.msra.mxu0 %v928_v3 }
 0x5ac   :  { %v828_v5 = vpop.xlane.xlu1 %827 }
 0x5ad   :  { %v832_v0 = vmul.f32 %v828_v5, %v2333_v10  ;;  %v880_v5 = vperm.slane %v2358_v36, 6 }
 0x5af   :  { %v834_v6 = vsub.f32 %v2530_v53, %v832_v0 }
 0x5b1   :  { %v836_v7 = vmul.f32 %v834_v6, %v834_v6 }
 0x5b3   :  { %v838_v63 = vsel %vm60_vm0, %v836_v7, 0.0 }
 0x5b4   :  { %839 = vadd.xlane.f32.xlu2 %v838_v63  ;;  %v831_v8 = vpop.xlane.xlu0 %830 }
 0x5b5   :  { %v833_v9 = vmul.f32 %v831_v8, %v2333_v10 }
 0x5b7   :  { %v835_v11 = vsub.f32 %v2536_v1, %v833_v9 }
 0x5b9   :  { %v837_v2 = vmul.f32 %v835_v11, %v835_v11 }
 0x5bb   :  { %v841_v12 = vsel %vm60_vm0, %v837_v2, 0.0 }
 0x5bc   :  { %842 = vadd.xlane.f32.xlu2 %v841_v12 }
 0x627   :  { %v840_v17 = vpop.xlane.xlu2 %839 }
 0x628   :  { %v844_v18 = vmul.f32 %v840_v17, %v2333_v10 }
 0x62a   :  { %v846_v19 = vadd.f32 1e-05, %v844_v18 }
 0x62c   :  { %2171 = vrsqrt.f32 %v846_v19  ;;  %vm854_vm15 = vweird.f32 %v846_v19 }
 0x62f   :  { %v843_v60 = vpop.xlane.xlu2 %842 }
 0x630   :  { %v845_v23 = vmul.f32 %v843_v60, %v2333_v10 }
 0x632   :  { %v2172_v26 = vpop.eup %2171  ;;  %v847_v27 = vadd.f32 1e-05, %v845_v23 }
 0x633   :  { %v849_v28 = vmul.f32 %v2172_v26, %v846_v19  ;;  %vm855_vm14 = vweird.f32 %v2172_v26 }
 0x634   :  { %2173 = vrsqrt.f32 %v847_v27  ;;  %vm856_vm1 = vmor %vm854_vm15, %vm855_vm14  ;;  %vm864_vm3 = vweird.f32 %v847_v27 }
 0x635   :  { %v850_v56 = vmul.f32 %v2172_v26, %v849_v28 }
 0x637   :  { %v851_v59 = vmul.f32 0.5, %v850_v56 }
 0x639   :  { %v852_v29 = vsub.f32 1.5, %v851_v59 }
 0x63a   :  { %v2174_v30 = vpop.eup %2173 }
 0x63b   :  { %v853_v31 = vmul.f32 %v2172_v26, %v852_v29  ;;  %v859_v32 = vmul.f32 %v2174_v30, %v847_v27  ;;  %vm865_vm2 = vweird.f32 %v2174_v30 }
 0x63c   :  { %vm866_vm4 = vmor %vm864_vm3, %vm865_vm2  ;;  %vm1886_vm2 = vcmask 1041409   ;;  %vm1889_vm3 = vcmask 254976  }
 0x63d   :  { %v857_v34 = vsel %vm856_vm1, %v2172_v26, %v853_v31  ;;  %v860_v35 = vmul.f32 %v2174_v30, %v859_v32  ;;  %v969_v26 = vperm.slane %v2358_v36, 7 }
 0x63e   :  { %v868_v37 = vmul.f32 %v857_v34, %v834_v6 }
 0x63f   :  { %v861_v39 = vmul.f32 0.5, %v860_v35 }
 0x640   :  { %v871_v40 = vmul.f32 %v870_v33, %v868_v37 }
 0x641   :  { %v862_v41 = vsub.f32 1.5, %v861_v39 }
 0x642   :  { %v874_v42 = vadd.f32 %v873_v38, %v871_v40 }
 0x643   :  { %v863_v43 = vmul.f32 %v2174_v30, %v862_v41  ;;  %v2030_v41 = vld [vmem:[%s2930_s2 + $0x38] sm:$0xff] }
 0x644   :  { %2024 = vmatmul.msk.f32.vlgmr.msrb.gmra.mxu3 %vm60_vm0, %v874_v42  ;;  %1048 = vmatpush.msra.mxu1 %v2030_v41  ;;  %v2029_v42 = vld [vmem:[%s2930_s2 + $0x30] sm:$0xff] }
 0x645   :  { %v867_v44 = vsel %vm866_vm4, %v2174_v30, %v863_v43  ;;  %v2028_v43 = vld [vmem:[%s2930_s2 + $0x28] sm:$0xff] }
 0x646   :  { %v869_v45 = vmul.f32 %v867_v44, %v835_v11  ;;  %1049 = vmatpush.msra.mxu1 %v2029_v42  ;;  %v2027_v44 = vld [vmem:[%s2930_s2 + $0x20] sm:$0xff] }
 0x648   :  { %v872_v46 = vmul.f32 %v870_v33, %v869_v45  ;;  %1050 = vmatpush.msra.mxu1 %v2028_v43 }
 0x64a   :  { %v875_v47 = vadd.f32 %v873_v38, %v872_v46  ;;  %1051 = vmatpush.msra.mxu1 %v2027_v44 }
 0x64c   :  { %2025 = vmatmul.msk.f32.gmra.mxu3 %vm60_vm0, %v875_v47 }
 0x6c7   :  { %v904_v0 = vpop.f32.mrf.mxu3 }
 0x6c8   :  { %v905_v6 = vadd.f32 %v904_v0, %v880_v5 }
 0x6ca   :  { %v912_v7 = vmul.f32 0.044715, %v905_v6  ;;  %v910_v19 = vmul.f32 0.5, %v905_v6 }
 0x6cc   :  { %v914_v63 = vmul.f32 %v912_v7, %v905_v6 }
 0x6ce   :  { %v916_v8 = vmul.f32 %v914_v63, %v905_v6  ;;  %v1021_v63 = vperm.slane %v2647_v57, 1 }
 0x6cf   :  { %v907_v9 = vpop.f32.mrf.mxu3 }
 0x6d0   :  { %v908_v11 = vadd.f32 %v907_v9, %v880_v5  ;;  %v918_v2 = vadd.f32 %v916_v8, %v905_v6  ;;  %v1018_v5 = vperm.slane %v2647_v57, 0 }
 0x6d2   :  { %v920_v12 = vmul.f32 0.7978846, %v918_v2  ;;  %v913_v13 = vmul.f32 0.044715, %v908_v11  ;;  %v911_v60 = vmul.f32 0.5, %v908_v11 }
 0x6d4   :  { %2175 = vtanh.f32 %v920_v12  ;;  %v915_v14 = vmul.f32 %v913_v13, %v908_v11 }
 0x6d6   :  { %v917_v15 = vmul.f32 %v915_v14, %v908_v11 }
 0x6d8   :  { %v919_v16 = vadd.f32 %v917_v15, %v908_v11 }
 0x6da   :  { %v2176_v17 = vpop.eup %2175  ;;  %v921_v18 = vmul.f32 0.7978846, %v919_v16 }
 0x6db   :  { %v924_v20 = vadd.f32 1.0, %v2176_v17  ;;  %v1029_v17 = vperm.slane %v2647_v57, 2 }
 0x6dc   :  { %2177 = vtanh.f32 %v921_v18 }
 0x6dd   :  { %v926_v22 = vmul.f32 %v924_v20, %v910_v19 }
 0x6df   :  { %960 = vmatmul.f32.vlgmr.msra.gmra.mxu0 %v926_v22 }
 0x6e2   :  { %v2178_v58 = vpop.eup %2177 }
 0x6e3   :  { %v925_v23 = vadd.f32 1.0, %v2178_v58 }
 0x6e5   :  { %v927_v24 = vmul.f32 %v925_v23, %v911_v60 }
 0x6e7   :  { %963 = vmatmul.f32.gmra.mxu0 %v927_v24 }
 0x75c   :  { %v961_v27 = vpop.f32.mrf.mxu0 }
 0x75d   :  { %v967_v28 = vadd.f32 %v961_v27, %v2530_v53 }
 0x75f   :  { %v2615_v56 = vadd.f32 %v969_v26, %v967_v28 }
 0x761   :  { %v974_v59 = vsel %vm60_vm0, %v2615_v56, 0.0 }
 0x762   :  { %975 = vadd.xlane.f32.xlu2 %v974_v59 }
 0x764   :  { %v964_v29 = vpop.f32.mrf.mxu0 }
 0x765   :  { %v968_v30 = vadd.f32 %v964_v29, %v2536_v1 }
 0x767   :  { %v2620_v31 = vadd.f32 %v969_v26, %v968_v30 }
 0x769   :  { %v977_v32 = vsel %vm60_vm0, %v2620_v31, 0.0 }
 0x76a   :  { %978 = vadd.xlane.f32.xlu1 %v977_v32 }
 0x7d5   :  { %v976_v33 = vpop.xlane.xlu2 %975 }
 0x7d6   :  { %v980_v36 = vmul.f32 %v976_v33, %v2333_v10 }
 0x7d8   :  { %v982_v53 = vsub.f32 %v2615_v56, %v980_v36 }
 0x7da   :  { %v984_v34 = vmul.f32 %v982_v53, %v982_v53 }
 0x7dc   :  { %v986_v35 = vsel %vm60_vm0, %v984_v34, 0.0 }
 0x7dd   :  { %v979_v37 = vpop.xlane.xlu1 %978  ;;  %987 = vadd.xlane.f32.xlu2 %v986_v35 }
 0x7de   :  { %v981_v38 = vmul.f32 %v979_v37, %v2333_v10 }
 0x7e0   :  { %v983_v1 = vsub.f32 %v2620_v31, %v981_v38 }
 0x7e2   :  { %v985_v39 = vmul.f32 %v983_v1, %v983_v1 }
 0x7e4   :  { %v989_v40 = vsel %vm60_vm0, %v985_v39, 0.0 }
 0x7e5   :  { %990 = vadd.xlane.f32.xlu0 %v989_v40 }
 0x850   :  { %v988_v45 = vpop.xlane.xlu2 %987 }
 0x851   :  { %v992_v46 = vmul.f32 %v988_v45, %v2333_v10 }
 0x853   :  { %v994_v47 = vadd.f32 1e-05, %v992_v46 }
 0x855   :  { %2179 = vrsqrt.f32 %v994_v47  ;;  %vm1002_vm6 = vweird.f32 %v994_v47 }
 0x858   :  { %v991_v48 = vpop.xlane.xlu0 %990 }
 0x859   :  { %v993_v49 = vmul.f32 %v991_v48, %v2333_v10 }
 0x85b   :  { %v2180_v50 = vpop.eup %2179  ;;  %v995_v51 = vadd.f32 1e-05, %v993_v49 }
 0x85c   :  { %v997_v52 = vmul.f32 %v2180_v50, %v994_v47  ;;  %vm1003_vm5 = vweird.f32 %v2180_v50 }
 0x85d   :  { %2181 = vrsqrt.f32 %v995_v51  ;;  %vm1004_vm7 = vmor %vm1002_vm6, %vm1003_vm5  ;;  %vm1012_vm10 = vweird.f32 %v995_v51 }
 0x85e   :  { %v998_v54 = vmul.f32 %v2180_v50, %v997_v52 }
 0x860   :  { %v999_v55 = vmul.f32 0.5, %v998_v54 }
 0x862   :  { %v1000_v4 = vsub.f32 1.5, %v999_v55 }
 0x863   :  { %v2182_v61 = vpop.eup %2181 }
 0x864   :  { %v1001_v62 = vmul.f32 %v2180_v50, %v1000_v4  ;;  %v1007_v3 = vmul.f32 %v2182_v61, %v995_v51  ;;  %vm1013_vm9 = vweird.f32 %v2182_v61 }
 0x865   :  { %vm1014_vm11 = vmor %vm1012_vm10, %vm1013_vm9 }
 0x866   :  { %v1005_v0 = vsel %vm1004_vm7, %v2180_v50, %v1001_v62  ;;  %v1008_v6 = vmul.f32 %v2182_v61, %v1007_v3  ;;  %vm1972_vm7 = vcmask 9216  }
 0x867   :  { %v1016_v7 = vmul.f32 %v1005_v0, %v982_v53 }
 0x868   :  { %v1009_v8 = vmul.f32 0.5, %v1008_v6 }
 0x869   :  { %v1019_v9 = vmul.f32 %v1018_v5, %v1016_v7 }
 0x86a   :  { %v1010_v11 = vsub.f32 1.5, %v1009_v8 }
 0x86b   :  { %v1022_v2 = vadd.f32 %v1021_v63, %v1019_v9 }
 0x86c   :  { %v1011_v12 = vmul.f32 %v2182_v61, %v1010_v11 }
 0x86d   :  { %2031 = vmatmul.msk.f32.vlgmr.msra.gmra.mxu1 %vm60_vm0, %v1022_v2 }
 0x86e   :  { %v1015_v13 = vsel %vm1014_vm11, %v2182_v61, %v1011_v12 }
 0x86f   :  { %v1017_v14 = vmul.f32 %v1015_v13, %v983_v1 }
 0x871   :  { %v1020_v15 = vmul.f32 %v1018_v5, %v1017_v14 }
 0x873   :  { %v1023_v16 = vadd.f32 %v1021_v63, %v1020_v15 }
 0x875   :  { %2032 = vmatmul.msk.f32.gmra.mxu1 %vm60_vm0, %v1023_v16 }
 0x8ea   :  { %v1053_v18 = vpop.f32.mrf.mxu1 }
 0x8eb   :  { %v2654_v19 = vadd.f32 %v1053_v18, %v1029_v17 }
 0x8ed   :  { %1065 = vrot.lane.b32.xlu2 %v2654_v19, %s2253_s12  ;;  %1061 = vrot.lane.b32.xlu1 %v2654_v19, %s2252_s30 }
 0x8f2   :  { %v1056_v20 = vpop.f32.mrf.mxu1 }
 0x8f3   :  { %v2660_v22 = vadd.f32 %v1056_v20, %v1029_v17 }
 0x8f5   :  { %1063 = vrot.lane.b32.xlu0 %v2660_v22, %s2252_s30  ;;  %1067 = vrot.lane.b32.xlu2 %v2660_v22, %s2253_s12 }
 0x8f6   :  { %1071 = vrot.lane.b32.xlu1 %v2660_v22, %s2254_s13 }
 0x8fd   :  { %1069 = vrot.lane.b32.xlu0 %v2654_v19, %s2254_s13 }
 0x8fe   :  { %1073 = vrot.lane.b32.xlu1 %v2654_v19, %s2255_s14 }
 0x905   :  { %1099 = vrot.lane.b32.xlu0 %v2660_v22, %s2255_s14 }
 0x947   :  { %v2674_v58 = vpop.permute.xlu2 %1065 }
 0x948   :  { %1177 = vrot.lane.b32.xlu1 %v2674_v58, %s2255_s14 }
 0x94f   :  { %v2690_v26 = vpop.permute.xlu2 %1067 }
 0x95f   :  { %v2678_v60 = vpop.permute.xlu1 %1061 }
 0x960   :  { %1125 = vrot.lane.b32.xlu2 %v2678_v60, %s2255_s14 }
 0x967   :  { %v2682_v23 = vpop.permute.xlu0 %1063 }
 0x968   :  { %v2684_v24 = vpop.permute.xlu1 %1071  ;;  %1151 = vrot.lane.b32.xlu0 %v2682_v23, %s2255_s14  ;;  %v2120_v18 = vpack.i.bf16 %v2674_v58, %v2682_v23 }
 0x969   :  { %1255 = vrot.lane.b32.xlu2 %v2684_v24, %s2255_s14 }
 0x96f   :  { %v2692_v27 = vpop.permute.xlu0 %1069 }
 0x970   :  { %v1074_v28 = vpop.permute.xlu1 %1073  ;;  %1203 = vrot.lane.b32.xlu0 %v2690_v26, %s2255_s14  ;;  %1229 = vrot.lane.b32.xlu1 %v2692_v27, %s2255_s14  ;;  %v2125_v20 = vpack.i.bf16 %v2684_v24, %v2692_v27 }
 0x971   :  { %2033 = vmatpush.xpose.msk.msra.mxu2 %vm168_vm8, %v1074_v28 }
 0x974   :  { %2034 = vmatmul.msk.f32.vlgmr.msra.gmra.mxu2 %vm168_vm8, %v2654_v19 }
 0x977   :  { %v1100_v59 = vpop.permute.xlu0 %1099 }
 0x978   :  { %2035 = vmatpush.xpose.msk.msrb.mxu2 %vm168_vm8, %v1100_v59 }
 0x97c   :  { %2036 = vmatmul.msk.f32.vlgmr.msrb.gmra.mxu2 %vm168_vm8, %v2660_v22 }
 0x9ba   :  { %v1126_v29 = vpop.permute.xlu2 %1125  ;;  %v1178_v30 = vpop.permute.xlu1 %1177 }
 0x9bb   :  { %2037 = vmatpush.xpose.msk.msra.mxu3 %vm168_vm8, %v1126_v29  ;;  %2041 = vmatpush.xpose.msk.msra.mxu2 %vm168_vm8, %v1178_v30 }
 0x9be   :  { %2038 = vmatmul.msk.f32.vlgmr.msra.gmra.mxu3 %vm168_vm8, %v2678_v60  ;;  %2042 = vmatmul.msk.f32.vlgmr.msra.gmra.mxu2 %vm168_vm8, %v2674_v58 }
 0x9c3   :  { %v1256_v32 = vpop.permute.xlu2 %1255 }
 0x9c4   :  { %2047 = vmatpush.xpose.msk.msrb.mxu2 %vm168_vm8, %v1256_v32 }
 0x9c7   :  { %2048 = vmatmul.msk.f32.vlgmr.msrb.gmra.mxu2 %vm168_vm8, %v2684_v24 }
 0x9da   :  { %v1152_v33 = vpop.permute.xlu0 %1151 }
 0x9db   :  { %2039 = vmatpush.xpose.msk.msrb.mxu1 %vm168_vm8, %v1152_v33 }
 0x9de   :  { %2040 = vmatmul.msk.f32.vlgmr.msrb.gmra.mxu1 %vm168_vm8, %v2682_v23 }
 0x9e2   :  { %v1204_v36 = vpop.permute.xlu0 %1203  ;;  %v1230_v53 = vpop.permute.xlu1 %1229 }
 0x9e3   :  { %2043 = vmatpush.xpose.msk.msrb.mxu3 %vm168_vm8, %v1204_v36  ;;  %2045 = vmatpush.xpose.msk.msra.mxu1 %vm168_vm8, %v1230_v53 }
 0x9e6   :  { %2044 = vmatmul.msk.f32.vlgmr.msrb.gmra.mxu3 %vm168_vm8, %v2690_v26  ;;  %2046 = vmatmul.msk.f32.vlgmr.msra.gmra.mxu1 %vm168_vm8, %v2692_v27 }
 0x9f7   :  { %v1096_v34 = vpop.f32.mrf.mxu2 }
 0x9f8   :  { %v1281_v35 = vmul.f32 0.35355338, %v1096_v34 }
 0x9fa   :  { %v1289_v37 = vadd.f32 %v1281_v35, %v2439_v25 }
 0x9fc   :  { %v1297_v38 = vsel %vm168_vm8, %v1289_v37, -inf }
 0x9fd   :  { %1298 = vmax.xlane.f32.xlu2 %v1297_v38  ;;  %v2115_v38 = vpack.i.bf16 %v2678_v60, %v2654_v19 }
 0x9ff   :  { %v1122_v1 = vpop.f32.mrf.mxu2 }
 0xa00   :  { %v1282_v39 = vmul.f32 0.35355338, %v1122_v1 }
 0xa02   :  { %v1290_v40 = vadd.f32 %v1282_v39, %v2436_v21 }
 0xa04   :  { %v1300_v41 = vsel %vm168_vm8, %v1290_v40, -inf }
 0xa05   :  { %1301 = vmax.xlane.f32.xlu2 %v1300_v41 }
 0xa41   :  { %v1148_v42 = vpop.f32.mrf.mxu3  ;;  %v1200_v43 = vpop.f32.mrf.mxu2 }
 0xa42   :  { %v1283_v44 = vmul.f32 0.35355338, %v1148_v42  ;;  %v1285_v45 = vmul.f32 0.35355338, %v1200_v43 }
 0xa44   :  { %v1291_v46 = vadd.f32 %v1283_v44, %v2439_v25  ;;  %v1293_v47 = vadd.f32 %v1285_v45, %v2439_v25 }
 0xa46   :  { %v1303_v48 = vsel %vm168_vm8, %v1291_v46, -inf  ;;  %v1309_v49 = vsel %vm168_vm8, %v1293_v47, -inf }
 0xa47   :  { %1304 = vmax.xlane.f32.xlu1 %v1303_v48  ;;  %1310 = vmax.xlane.f32.xlu2 %v1309_v49 }
 0xa4a   :  { %v1278_v52 = vpop.f32.mrf.mxu2 }
 0xa4b   :  { %v1288_v55 = vmul.f32 0.35355338, %v1278_v52 }
 0xa4d   :  { %v1296_v61 = vadd.f32 %v1288_v55, %v2436_v21 }
 0xa4f   :  { %v1318_v62 = vsel %vm168_vm8, %v1296_v61, -inf }
 0xa5b   :  { %v1174_v50 = vpop.f32.mrf.mxu1 }
 0xa5c   :  { %v1284_v51 = vmul.f32 0.35355338, %v1174_v50 }
 0xa5e   :  { %v1292_v54 = vadd.f32 %v1284_v51, %v2436_v21 }
 0xa60   :  { %v1306_v4 = vsel %vm168_vm8, %v1292_v54, -inf }
 0xa61   :  { %1307 = vmax.xlane.f32.xlu0 %v1306_v4 }
 0xa63   :  { %v1252_v0 = vpop.f32.mrf.mxu1 }
 0xa64   :  { %v1287_v7 = vmul.f32 0.35355338, %v1252_v0 }
 0xa66   :  { %v1295_v11 = vadd.f32 %v1287_v7, %v2439_v25 }
 0xa68   :  { %v1315_v12 = vsel %vm168_vm8, %v1295_v11, -inf }
 0xa69   :  { %v1226_v3 = vpop.f32.mrf.mxu3  ;;  %1319 = vmax.xlane.f32.xlu0 %v1318_v62 }
 0xa6a   :  { %v1286_v5 = vmul.f32 0.35355338, %v1226_v3 }
 0xa6c   :  { %v2735_v6 = vadd.f32 %v1286_v5, %v2436_v21 }
 0xa6e   :  { %v1312_v63 = vsel %vm168_vm8, %v2735_v6, -inf }
 0xa6f   :  { %1313 = vmax.xlane.f32.xlu1 %v1312_v63 }
 0xa70   :  { %v1299_v8 = vpop.xlane.xlu2 %1298 }
 0xa71   :  { %v1321_v9 = vsub.f32 %v1289_v37, %v1299_v8 }
 0xa73   :  { %v1329_v2 = vmul.f32 1.442695, %v1321_v9 }
 0xa75   :  { %2183 = vpow2.f32 %v1329_v2 }
 0xa77   :  { %1316 = vmax.xlane.f32.xlu1 %v1315_v12 }
 0xa78   :  { %v1302_v13 = vpop.xlane.xlu2 %1301 }
 0xa79   :  { %v1322_v14 = vsub.f32 %v1290_v40, %v1302_v13 }
 0xa7b   :  { %v2741_v15 = vpop.eup %2183  ;;  %v1331_v21 = vmul.f32 1.442695, %v1322_v14 }
 0xa7c   :  { %v1345_v16 = vsel %vm168_vm8, %v2741_v15, 0.0 }
 0xa7d   :  { %2185 = vpow2.f32 %v1331_v21  ;;  %1346 = vadd.xlane.f32.xlu0 %v1345_v16 }
 0xa83   :  { %v2745_v17 = vpop.eup %2185 }
 0xa84   :  { %v1348_v25 = vsel %vm168_vm8, %v2745_v17, 0.0 }
 0xa85   :  { %1349 = vadd.xlane.f32.xlu0 %v1348_v25 }
 0xa90   :  { %2121 = vrot.lane.b32.xlu1 %v2120_v18, %s2257_s0 }
 0xa99   :  { %2126 = vrot.lane.b32.xlu0 %v2125_v20, %s2257_s0 }
 0xaba   :  { %v1311_v28 = vpop.xlane.xlu2 %1310  ;;  %v1305_v59 = vpop.xlane.xlu1 %1304 }
 0xabb   :  { %v1325_v29 = vsub.f32 %v1293_v47, %v1311_v28  ;;  %v1323_v30 = vsub.f32 %v1291_v46, %v1305_v59 }
 0xabd   :  { %v1337_v32 = vmul.f32 1.442695, %v1325_v29  ;;  %v1333_v33 = vmul.f32 1.442695, %v1323_v30 }
 0xabf   :  { %2187 = vpow2.f32 %v1337_v32 }
 0xac0   :  { %2189 = vpow2.f32 %v1333_v33 }
 0xac5   :  { %v2755_v36 = vpop.eup %2187 }
 0xac6   :  { %v2190_v53 = vpop.eup %2189  ;;  %v1357_v58 = vsel %vm168_vm8, %v2755_v36, 0.0 }
 0xac7   :  { %1358 = vadd.xlane.f32.xlu0 %v1357_v58  ;;  %v1351_v23 = vsel %vm168_vm8, %v2190_v53, 0.0  ;;  %v2057_v58 = vld [vmem:[%s2931_s3 + $0x20] sm:$0xff] }
 0xac8   :  { %1352 = vadd.xlane.f32.xlu2 %v1351_v23 }
 0xad4   :  { %v1308_v24 = vpop.xlane.xlu0 %1307 }
 0xad5   :  { %v1324_v27 = vsub.f32 %v1292_v54, %v1308_v24 }
 0xad7   :  { %v1335_v34 = vmul.f32 1.442695, %v1324_v27  ;;  %v2060_v27 = vld [vmem:[%s2931_s3 + $0x38] sm:$0xff] }
 0xad9   :  { %2191 = vpow2.f32 %v1335_v34 }
 0xadc   :  { %v1320_v35 = vpop.xlane.xlu0 %1319 }
 0xadd   :  { %v1328_v37 = vsub.f32 %v1296_v61, %v1320_v35 }
 0xadf   :  { %v2192_v1 = vpop.eup %2191  ;;  %v1343_v39 = vmul.f32 1.442695, %v1328_v37 }
 0xae0   :  { %2116 = vrot.lane.b32.xlu2 %v2115_v38, %s2257_s0  ;;  %v1354_v40 = vsel %vm168_vm8, %v2192_v1, 0.0 }
 0xae1   :  { %2193 = vpow2.f32 %v1343_v39  ;;  %1355 = vadd.xlane.f32.xlu1 %v1354_v40 }
 0xae2   :  { %v1314_v41 = vpop.xlane.xlu1 %1313 }
 0xae3   :  { %v1326_v60 = vsub.f32 %v2735_v6, %v1314_v41 }
 0xae5   :  { %v1339_v49 = vmul.f32 1.442695, %v1326_v60  ;;  %v1728_v60 = vperm.slane %v2647_v57, 3 }
 0xae7   :  { %v2194_v42 = vpop.eup %2193 }
 0xae8   :  { %v1366_v43 = vsel %vm168_vm8, %v2194_v42, 0.0 }
 0xae9   :  { %1367 = vadd.xlane.f32.xlu0 %v1366_v43 }
 0xaea   :  { %v1317_v44 = vpop.xlane.xlu1 %1316 }
 0xaeb   :  { %v1327_v45 = vsub.f32 %v1295_v11, %v1317_v44 }
 0xaed   :  { %v1341_v46 = vmul.f32 1.442695, %v1327_v45 }
 0xaef   :  { %2195 = vpow2.f32 %v1341_v46 }
 0xaf0   :  { %v1347_v48 = vpop.xlane.xlu0 %1346  ;;  %2197 = vpow2.f32 %v1339_v49 }
 0xaf1   :  { %2199 = vrcp.f32 %v1347_v48 }
 0xaf5   :  { %v2196_v47 = vpop.eup %2195 }
 0xaf6   :  { %v1363_v19 = vsel %vm168_vm8, %v2196_v47, 0.0  ;;  %v2198_v54 = vpop.eup %2197 }
 0xaf7   :  { %1364 = vadd.xlane.f32.xlu1 %v1363_v19  ;;  %v1360_v55 = vsel %vm168_vm8, %v2198_v54, 0.0  ;;  %v2200_v3 = vpop.eup %2199 }
 0xaf8   :  { %v1350_v51 = vpop.xlane.xlu0 %1349  ;;  %v1377_v63 = vmul.f32 %v2200_v3, %v2741_v15 }
 0xafd   :  { %1515 = vrot.lane.b32.xlu0 %v2690_v26, %s2257_s0 }
 0xb02   :  { %v2122_v50 = vpop.permute.xlu1 %2121 }
 0xb03   :  { %v2123_v52 = vunpack.i.l.bf16 %v2122_v50  ;;  %v2124_v9 = vunpack.i.h.bf16 %v2122_v50 }
 0xb05   :  { %1484 = vmatpush.msra.mxu2 %v2123_v52 }
 0xb09   :  { %1361 = vadd.xlane.f32.xlu2 %v1360_v55 }
 0xb0b   :  { %v2127_v4 = vpop.permute.xlu0 %2126 }
 0xb0c   :  { %v2129_v61 = vunpack.i.h.bf16 %v2127_v4  ;;  %v2128_v11 = vunpack.i.l.bf16 %v2127_v4 }
 0xb0e   :  { %1588 = vmatpush.msrb.mxu2 %v2129_v61 }
 0xb10   :  { %1411 = vrot.lane.b32.xlu1 %v2660_v22, %s2257_s0 }
 0xb3a   :  { %v1359_v26 = vpop.xlane.xlu0 %1358 }
 0xb3b   :  { %v1353_v62 = vpop.xlane.xlu2 %1352 }
 0xb3c   :  { %2201 = vrcp.f32 %v1353_v62 }
 0xb3d   :  { %2203 = vrcp.f32 %v1359_v26 }
 0xb42   :  { %v2202_v5 = vpop.eup %2201 }
 0xb43   :  { %v2117_v0 = vpop.permute.xlu2 %2116  ;;  %v1379_v8 = vmul.f32 %v2202_v5, %v2190_v53  ;;  %v2204_v22 = vpop.eup %2203  ;;  %v2058_v53 = vld [vmem:[%s2931_s3 + $0x28] sm:$0xff] }
 0xb44   :  { %v2119_v6 = vunpack.i.h.bf16 %v2117_v0  ;;  %v2118_v7 = vunpack.i.l.bf16 %v2117_v0  ;;  %v1381_v2 = vmul.f32 %v2204_v22, %v2755_v36 }
 0xb46   :  { %1406 = vmatpush.msra.mxu3 %v2118_v7  ;;  %1458 = vmatpush.msrb.mxu1 %v2119_v6 }
 0xb47   :  { %2049 = vmatmul.msk.f32.vlgmr.msra.gmra.mxu3 %vm168_vm8, %v1377_v63  ;;  %2051 = vmatmul.msk.f32.vlgmr.msrb.gmra.mxu1 %vm168_vm8, %v1379_v8 }
 0xb48   :  { %1510 = vmatpush.msrb.mxu3 %v2124_v9  ;;  %1562 = vmatpush.msra.mxu1 %v2128_v11 }
 0xb4a   :  { %1619 = vmatpush.msra.mxu3 %v2057_v58  ;;  %v2089_v58 = vld [vmem:[%s2933_s5 + $0xf0] sm:$0xff] }
 0xb4f   :  { %2053 = vmatmul.msk.f32.vlgmr.msrb.gmra.mxu3 %vm168_vm8, %v1381_v2 }
 0xb54   :  { %v1356_v12 = vpop.xlane.xlu1 %1355 }
 0xb55   :  { %2205 = vrcp.f32 %v1356_v12 }
 0xb5b   :  { %v2206_v13 = vpop.eup %2205 }
 0xb5c   :  { %v1380_v14 = vmul.f32 %v2206_v13, %v2192_v1  ;;  %v1368_v15 = vpop.xlane.xlu0 %1367 }
 0xb5d   :  { %2207 = vrcp.f32 %v1368_v15 }
 0xb5e   :  { %2052 = vmatmul.msk.f32.vlgmr.msra.gmra.mxu2 %vm168_vm8, %v1380_v14 }
 0xb5f   :  { %1706 = vmatpush.msra.mxu2 %v2060_v27 }
 0xb63   :  { %v2208_v21 = vpop.eup %2207 }
 0xb64   :  { %v1384_v16 = vmul.f32 %v2208_v21, %v2194_v42 }
 0xb66   :  { %2056 = vmatmul.msk.f32.vlgmr.msrb.gmra.mxu2 %vm168_vm8, %v1384_v16  ;;  %v2072_v16 = vld [vmem:[%s2932_s4 + $0x38] sm:$0xff] }
 0xb67   :  { %1807 = vmatpush.msrb.mxu3 %v2072_v16 }
 0xb6a   :  { %v1365_v25 = vpop.xlane.xlu1 %1364 }
 0xb6b   :  { %2209 = vrcp.f32 %v1365_v25  ;;  %v2071_v25 = vld [vmem:[%s2932_s4 + $0x30] sm:$0xff] }
 0xb6c   :  { %2211 = vrcp.f32 %v1350_v51  ;;  %1808 = vmatpush.msrb.mxu3 %v2071_v25 }
 0xb6f   :  { %v1516_v32 = vpop.permute.xlu0 %1515 }
 0xb71   :  { %v2210_v18 = vpop.eup %2209 }
 0xb72   :  { %v1383_v20 = vmul.f32 %v2210_v18, %v2196_v47  ;;  %v2212_v59 = vpop.eup %2211  ;;  %v2070_v18 = vld [vmem:[%s2932_s4 + $0x28] sm:$0xff] }
 0xb73   :  { %v1378_v29 = vmul.f32 %v2212_v59, %v2745_v17  ;;  %v2059_v17 = vld [vmem:[%s2931_s3 + $0x30] sm:$0xff]  ;;  %1809 = vmatpush.msrb.mxu3 %v2070_v18 }
 0xb74   :  { %2055 = vmatmul.msk.f32.vlgmr.msra.gmra.mxu1 %vm168_vm8, %v1383_v20  ;;  %v2069_v20 = vld [vmem:[%s2932_s4 + $0x20] sm:$0xff] }
 0xb75   :  { %1677 = vmatpush.msrb.mxu1 %v2059_v17  ;;  %1810 = vmatpush.msrb.mxu3 %v2069_v20 }
 0xb7c   :  { %v1362_v28 = vpop.xlane.xlu2 %1361 }
 0xb7d   :  { %2213 = vrcp.f32 %v1362_v28 }
 0xb82   :  { %v1412_v30 = vpop.permute.xlu1 %1411 }
 0xb83   :  { %1432 = vmatpush.msrb.mxu0 %v1412_v30  ;;  %v2214_v33 = vpop.eup %2213 }
 0xb84   :  { %2050 = vmatmul.msk.f32.vlgmr.msrb.gmra.mxu0 %vm168_vm8, %v1378_v29  ;;  %v1382_v36 = vmul.f32 %v2214_v33, %v2198_v54 }
 0xb85   :  { %1536 = vmatpush.msra.mxu0 %v1516_v32 }
 0xb87   :  { %1648 = vmatpush.msrb.mxu0 %v2058_v53  ;;  %v2090_v53 = vld [vmem:[%s2933_s5 + $0xf8] sm:$0xff] }
 0xb8c   :  { %2054 = vmatmul.msk.f32.vlgmr.msra.gmra.mxu0 %vm168_vm8, %v1382_v36 }
 0xb8d   :  { %1853 = vmatpush.msra.mxu0 %v2090_v53 }
 0xb8f   :  { %1854 = vmatpush.msra.mxu0 %v2089_v58 }
 0xbc4   :  { %v1460_v23 = vpop.f32.mrf.mxu1 }
 0xbc5   :  { %2063 = vmatmul.msk.f32.vlgmr.msrb.gmra.mxu0 %vm168_vm8, %v1460_v23  ;;  %v2088_v23 = vld [vmem:[%s2933_s5 + $0xe8] sm:$0xff] }
 0xbc6   :  { %1855 = vmatpush.msra.mxu0 %v2088_v23  ;;  %v1878_v23 = vperm.slane %v2647_v57, 7 }
 0xbca   :  { %v1408_v24 = vpop.f32.mrf.mxu3 }
 0xbcb   :  { %2061 = vmatmul.msk.f32.vlgmr.msra.gmra.mxu3 %vm168_vm8, %v1408_v24 }
 0xbd2   :  { %v1512_v34 = vpop.f32.mrf.mxu3 }
 0xbd3   :  { %2065 = vmatmul.msk.f32.vlgmr.msrb.gmra.mxu1 %vm168_vm8, %v1512_v34  ;;  %v1777_v34 = vperm.slane %v2647_v57, 4 }
 0xbe1   :  { %v1486_v35 = vpop.f32.mrf.mxu2 }
 0xbe2   :  { %2064 = vmatmul.msk.f32.gmra.mxu0 %vm168_vm8, %v1486_v35 }
 0xbe9   :  { %v1590_v38 = vpop.f32.mrf.mxu2 }
 0xbf1   :  { %v1564_v37 = vpop.f32.mrf.mxu1 }
 0xbf2   :  { %2067 = vmatmul.msk.f32.vlgmr.msra.gmra.mxu2 %vm168_vm8, %v1564_v37  ;;  %v2087_v37 = vld [vmem:[%s2933_s5 + $0xe0] sm:$0xff] }
 0xbf3   :  { %1856 = vmatpush.msra.mxu0 %v2087_v37 }
 0xbfa   :  { %2068 = vmatmul.msk.f32.gmra.mxu2 %vm168_vm8, %v1590_v38 }
 0xc01   :  { %v1434_v1 = vpop.f32.mrf.mxu0 }
 0xc02   :  { %2062 = vmatmul.msk.f32.gmra.mxu3 %vm168_vm8, %v1434_v1 }
 0xc09   :  { %v1538_v39 = vpop.f32.mrf.mxu0 }
 0xc0a   :  { %2066 = vmatmul.msk.f32.gmra.mxu1 %vm168_vm8, %v1538_v39 }
 0xc42   :  { %v1650_v41 = vpop.f32.mrf.mxu0 }
 0xc43   :  { %v1715_v44 = vsel %vm60_vm0, %v1650_v41, 0.0 }
 0xc4e   :  { %v1621_v40 = vpop.f32.mrf.mxu3 }
 0xc4f   :  { %v1714_v42 = vsel %vm60_vm0, %v1621_v40, 0.0  ;;  %v1780_v40 = vperm.slane %v2647_v57, 5 }
 0xc50   :  { %v1679_v43 = vpop.f32.mrf.mxu1  ;;  %v1716_v45 = vadd.f32 %v1715_v44, %v1714_v42 }
 0xc51   :  { %v1717_v46 = vsel %vm60_vm0, %v1679_v43, 0.0 }
 0xc52   :  { %v1718_v47 = vadd.f32 %v1717_v46, %v1716_v45 }
 0xc5f   :  { %v1653_v54 = vpop.f32.mrf.mxu0 }
 0xc60   :  { %v1722_v4 = vsel %vm60_vm0, %v1653_v54, 0.0  ;;  %v2085_v54 = vld [vmem:[%s2933_s5 + $0xd0] sm:$0xff] }
 0xc75   :  { %v1708_v19 = vpop.f32.mrf.mxu2 }
 0xc76   :  { %v1719_v48 = vsel %vm60_vm0, %v1708_v19, 0.0 }
 0xc77   :  { %v1720_v49 = vadd.f32 %v1719_v48, %v1718_v47 }
 0xc79   :  { %v1729_v50 = vadd.f32 %v1728_v60, %v1720_v49 }
 0xc7b   :  { %v2809_v51 = vadd.f32 %v1729_v50, %v2615_v56 }
 0xc7d   :  { %v1733_v52 = vsel %vm60_vm0, %v2809_v51, 0.0  ;;  %v1711_v62 = vpop.f32.mrf.mxu2 }
 0xc7e   :  { %1734 = vadd.xlane.f32.xlu1 %v1733_v52  ;;  %v1726_v6 = vsel %vm60_vm0, %v1711_v62, 0.0  ;;  %v2086_v52 = vld [vmem:[%s2933_s5 + $0xd8] sm:$0xff]  ;;  %v2081_v62 = vld [vmem:[%s2933_s5 + $0xb0] sm:$0xff] }
 0xc7f   :  { %1857 = vmatpush.msra.mxu0 %v2086_v52 }
 0xc81   :  { %1858 = vmatpush.msra.mxu0 %v2085_v54 }
 0xc85   :  { %v1624_v55 = vpop.f32.mrf.mxu3 }
 0xc86   :  { %v1721_v61 = vsel %vm60_vm0, %v1624_v55, 0.0  ;;  %v2084_v55 = vld [vmem:[%s2933_s5 + $0xc8] sm:$0xff] }
 0xc87   :  { %v1723_v3 = vadd.f32 %v1722_v4, %v1721_v61  ;;  %v1682_v26 = vpop.f32.mrf.mxu1  ;;  %1859 = vmatpush.msra.mxu0 %v2084_v55  ;;  %v2083_v4 = vld [vmem:[%s2933_s5 + $0xc0] sm:$0xff]  ;;  %v2082_v61 = vld [vmem:[%s2933_s5 + $0xb8] sm:$0xff] }
 0xc88   :  { %v1724_v5 = vsel %vm60_vm0, %v1682_v26, 0.0  ;;  %v2079_v26 = vld [vmem:[%s2933_s5 + $0xa0] sm:$0xff] }
 0xc89   :  { %v1725_v0 = vadd.f32 %v1724_v5, %v1723_v3  ;;  %1860 = vmatpush.msra.mxu0 %v2083_v4  ;;  %v2080_v3 = vld [vmem:[%s2933_s5 + $0xa8] sm:$0xff]  ;;  %v2078_v5 = vld [vmem:[%s2933_s5 + $0x98] sm:$0xff] }
 0xc8b   :  { %v1727_v56 = vadd.f32 %v1726_v6, %v1725_v0  ;;  %1861 = vmatpush.msra.mxu0 %v2082_v61  ;;  %v2077_v0 = vld [vmem:[%s2933_s5 + $0x90] sm:$0xff]  ;;  %v2076_v6 = vld [vmem:[%s2933_s5 + $0x88] sm:$0xff] }
 0xc8d   :  { %v1730_v7 = vadd.f32 %v1728_v60, %v1727_v56  ;;  %1862 = vmatpush.msra.mxu0 %v2081_v62  ;;  %v2075_v56 = vld [vmem:[%s2933_s5 + $0x80] sm:$0xff] }
 0xc8f   :  { %v2818_v63 = vadd.f32 %v1730_v7, %v2620_v31  ;;  %1863 = vmatpush.msra.mxu0 %v2080_v3  ;;  %v1788_v7 = vperm.slane %v2647_v57, 6  ;;  %v2130_v3 = vld [vmem:[%s2935_s7] ss:$0 sm:$0xff]  ;;  %s2258_s7 = smov [#allocation2]  }
 0xc90   :  { %s1979_s28 = sshll.u32 %s2258_s7, 4  ;;  %s1980_s28 = int_to_ptr.vmem [resolvable:$true] %s1979_s28 }
 0xc91   :  { %v1736_v8 = vsel %vm60_vm0, %v2818_v63, 0.0  ;;  %1864 = vmatpush.msra.mxu0 %v2079_v26 }
 0xc92   :  { %1737 = vadd.xlane.f32.xlu0 %v1736_v8 }
 0xc93   :  { %1865 = vmatpush.msra.mxu0 %v2078_v5 }
 0xc95   :  { %1866 = vmatpush.msra.mxu0 %v2077_v0 }
 0xc97   :  { %1867 = vmatpush.msra.mxu0 %v2076_v6 }
 0xc99   :  { %1868 = vmatpush.msra.mxu0 %v2075_v56  ;;  %v2131_v56 = vld [vmem:[%s2936_s8] ss:$0 sm:$0xff] }
 0xcf1   :  { %v1735_v9 = vpop.xlane.xlu1 %1734 }
 0xcf2   :  { %v1739_v11 = vmul.f32 %v1735_v9, %v2333_v10 }
 0xcf4   :  { %v1741_v22 = vsub.f32 %v2809_v51, %v1739_v11 }
 0xcf6   :  { %v1743_v2 = vmul.f32 %v1741_v22, %v1741_v22 }
 0xcf8   :  { %v1745_v12 = vsel %vm60_vm0, %v1743_v2, 0.0 }
 0xcf9   :  { %1746 = vadd.xlane.f32.xlu2 %v1745_v12 }
 0xd05   :  { %v1738_v13 = vpop.xlane.xlu0 %1737 }
 0xd06   :  { %v1740_v14 = vmul.f32 %v1738_v13, %v2333_v10 }
 0xd08   :  { %v1742_v15 = vsub.f32 %v2818_v63, %v1740_v14 }
 0xd0a   :  { %v1744_v31 = vmul.f32 %v1742_v15, %v1742_v15 }
 0xd0c   :  { %v1748_v21 = vsel %vm60_vm0, %v1744_v31, 0.0 }
 0xd0d   :  { %1749 = vadd.xlane.f32.xlu2 %v1748_v21 }
 0xd6c   :  { %v1747_v28 = vpop.xlane.xlu2 %1746 }
 0xd6d   :  { %v1751_v59 = vmul.f32 %v1747_v28, %v2333_v10 }
 0xd6f   :  { %v1753_v29 = vadd.f32 1e-05, %v1751_v59 }
 0xd71   :  { %2215 = vrsqrt.f32 %v1753_v29  ;;  %vm1761_vm12 = vweird.f32 %v1753_v29 }
 0xd77   :  { %v2216_v30 = vpop.eup %2215 }
 0xd78   :  { %v1756_v32 = vmul.f32 %v2216_v30, %v1753_v29  ;;  %vm1762_vm8 = vweird.f32 %v2216_v30 }
 0xd79   :  { %vm1763_vm13 = vmor %vm1761_vm12, %vm1762_vm8 }
 0xd7a   :  { %v1757_v33 = vmul.f32 %v2216_v30, %v1756_v32 }
 0xd7c   :  { %v1758_v36 = vmul.f32 0.5, %v1757_v33 }
 0xd7e   :  { %v1759_v17 = vsub.f32 1.5, %v1758_v36 }
 0xd80   :  { %v1760_v24 = vmul.f32 %v2216_v30, %v1759_v17  ;;  %v1750_v27 = vpop.xlane.xlu2 %1749 }
 0xd81   :  { %v1752_v35 = vmul.f32 %v1750_v27, %v2333_v10 }
 0xd82   :  { %v1764_v38 = vsel %vm1763_vm13, %v2216_v30, %v1760_v24 }
 0xd83   :  { %v1775_v1 = vmul.f32 %v1764_v38, %v1741_v22  ;;  %v1754_v39 = vadd.f32 1e-05, %v1752_v35 }
 0xd85   :  { %v1778_v41 = vmul.f32 %v1777_v34, %v1775_v1  ;;  %2217 = vrsqrt.f32 %v1754_v39  ;;  %vm1771_vm15 = vweird.f32 %v1754_v39 }
 0xd87   :  { %v1781_v42 = vadd.f32 %v1780_v40, %v1778_v41 }
 0xd89   :  { %2073 = vmatmul.msk.f32.vlgmr.msrb.gmra.mxu3 %vm60_vm0, %v1781_v42 }
 0xd8b   :  { %v2218_v43 = vpop.eup %2217 }
 0xd8c   :  { %v1766_v44 = vmul.f32 %v2218_v43, %v1754_v39  ;;  %vm1772_vm14 = vweird.f32 %v2218_v43 }
 0xd8d   :  { %vm1773_vm1 = vmor %vm1771_vm15, %vm1772_vm14 }
 0xd8e   :  { %v1767_v45 = vmul.f32 %v2218_v43, %v1766_v44 }
 0xd90   :  { %v1768_v46 = vmul.f32 0.5, %v1767_v45  ;;  %v1941_v45 = vld [vmem:[%s2937_s9 + $0x18] sm:$0xff] }
 0xd91   :  { %1964 = vmatpush.msra.mxu1 %v1941_v45 }
 0xd92   :  { %v1769_v47 = vsub.f32 1.5, %v1768_v46  ;;  %v1940_v46 = vld [vmem:[%s2937_s9 + $0x10] sm:$0xff] }
 0xd93   :  { %1965 = vmatpush.msra.mxu1 %v1940_v46 }
 0xd94   :  { %v1770_v19 = vmul.f32 %v2218_v43, %v1769_v47  ;;  %v1939_v47 = vld [vmem:[%s2937_s9 + $0x8] sm:$0xff] }
 0xd95   :  { %1966 = vmatpush.msra.mxu1 %v1939_v47 }
 0xd96   :  { %v1774_v60 = vsel %vm1773_vm1, %v2218_v43, %v1770_v19  ;;  %v1938_v19 = vld [vmem:[%s2937_s9] sm:$0xff] }
 0xd97   :  { %v1776_v48 = vmul.f32 %v1774_v60, %v1742_v15  ;;  %1967 = vmatpush.msra.mxu1 %v1938_v19 }
 0xd99   :  { %v1779_v49 = vmul.f32 %v1777_v34, %v1776_v48 }
 0xd9b   :  { %v1782_v50 = vadd.f32 %v1780_v40, %v1779_v49 }
 0xd9d   :  { %2074 = vmatmul.msk.f32.gmra.mxu3 %vm60_vm0, %v1782_v50 }
 0xe0c   :  { %v1812_v8 = vpop.f32.mrf.mxu3 }
 0xe0d   :  { %v1813_v9 = vadd.f32 %v1812_v8, %v1788_v7 }
 0xe0f   :  { %v1820_v11 = vmul.f32 0.044715, %v1813_v9  ;;  %v1818_v31 = vmul.f32 0.5, %v1813_v9 }
 0xe11   :  { %v1822_v22 = vmul.f32 %v1820_v11, %v1813_v9 }
 0xe13   :  { %v1824_v2 = vmul.f32 %v1822_v22, %v1813_v9  ;;  %v2132_v22 = vld [vmem:[%s2938_s10] ss:$0 sm:$0xff] }
 0xe15   :  { %v1826_v12 = vadd.f32 %v1824_v2, %v1813_v9 }
 0xe17   :  { %v1828_v13 = vmul.f32 0.7978846, %v1826_v12 }
 0xe19   :  { %2219 = vtanh.f32 %v1828_v13 }
 0xe1f   :  { %v2220_v14 = vpop.eup %2219 }
 0xe20   :  { %v1815_v15 = vpop.f32.mrf.mxu3  ;;  %v1832_v21 = vadd.f32 1.0, %v2220_v14 }
 0xe21   :  { %v1816_v16 = vadd.f32 %v1815_v15, %v1788_v7 }
 0xe22   :  { %v1834_v25 = vmul.f32 %v1832_v21, %v1818_v31 }
 0xe23   :  { %v1821_v18 = vmul.f32 0.044715, %v1816_v16  ;;  %v1819_v32 = vmul.f32 0.5, %v1816_v16 }
 0xe24   :  { %1869 = vmatmul.f32.vlgmr.msra.gmra.mxu0 %v1834_v25 }
 0xe25   :  { %v1823_v20 = vmul.f32 %v1821_v18, %v1816_v16 }
 0xe27   :  { %v1825_v28 = vmul.f32 %v1823_v20, %v1816_v16 }
 0xe29   :  { %v1827_v59 = vadd.f32 %v1825_v28, %v1816_v16 }
 0xe2b   :  { %v1829_v29 = vmul.f32 0.7978846, %v1827_v59 }
 0xe2d   :  { %2221 = vtanh.f32 %v1829_v29 }
 0xe33   :  { %v2222_v30 = vpop.eup %2221 }
 0xe34   :  { %v1833_v33 = vadd.f32 1.0, %v2222_v30 }
 0xe36   :  { %v1835_v36 = vmul.f32 %v1833_v33, %v1819_v32 }
 0xe38   :  { %1872 = vmatmul.f32.gmra.mxu0 %v1835_v36 }
 0xea1   :  { %v1870_v53 = vpop.f32.mrf.mxu0 }
 0xea2   :  { %v1876_v17 = vadd.f32 %v1870_v53, %v2809_v51 }
 0xea4   :  { %v1879_v34 = vadd.f32 %v1878_v23, %v1876_v17 }
 0xeb5   :  { %v1873_v58 = vpop.f32.mrf.mxu0 }
 0xeb6   :  { %v1877_v24 = vadd.f32 %v1873_v58, %v2818_v63 }
 0xeb8   :  { %v1880_v27 = vadd.f32 %v1878_v23, %v1877_v24 }
 0xeba   :  { %v1885_v35 = vrot.slane %v1880_v27, 7 }
 0xebc   :  { %v1887_v37 = vsel %vm1886_vm2, %v1885_v35, %v1879_v34 }
 0xebd   :  { %v1890_v38 = vsel %vm1889_vm3, %v1887_v37, 0.0 }
 0xebe   :  { %1891 = vadd.xlane.f32.xlu2 %v1890_v38 }
 0xf31   :  { %v1892_v1 = vpop.xlane.xlu2 %1891 }
 0xf32   :  { %v1893_v39 = vmul.f32 %v1892_v1, %v2333_v10 }
 0xf34   :  { %v1895_v40 = vrot.slane %v1893_v39, 1  ;;  %v1898_v41 = vsub.f32 %v1879_v34, %v1893_v39 }
 0xf36   :  { %v1899_v42 = vsub.f32 %v1880_v27, %v1895_v40  ;;  %v1900_v43 = vmul.f32 %v1898_v41, %v1898_v41 }
 0xf38   :  { %v1901_v51 = vmul.f32 %v1899_v42, %v1899_v42 }
 0xf3a   :  { %v1904_v57 = vrot.slane %v1901_v51, 7 }
 0xf3c   :  { %v1905_v63 = vsel %vm1886_vm2, %v1904_v57, %v1900_v43 }
 0xf3d   :  { %v1907_v44 = vsel %vm1889_vm3, %v1905_v63, 0.0 }
 0xf3e   :  { %1908 = vadd.xlane.f32.xlu1 %v1907_v44 }
 0xfb1   :  { %v1909_v60 = vpop.xlane.xlu1 %1908 }
 0xfb2   :  { %v1910_v48 = vmul.f32 %v1909_v60, %v2333_v10 }
 0xfb4   :  { %v1911_v49 = vadd.f32 1e-05, %v1910_v48 }
 0xfb6   :  { %2223 = vrsqrt.f32 %v1911_v49  ;;  %vm1918_vm5 = vweird.f32 %v1911_v49 }
 0xfbc   :  { %v2224_v50 = vpop.eup %2223 }
 0xfbd   :  { %v1913_v52 = vmul.f32 %v2224_v50, %v1911_v49  ;;  %vm1919_vm4 = vweird.f32 %v2224_v50 }
 0xfbe   :  { %vm1920_vm6 = vmor %vm1918_vm5, %vm1919_vm4 }
 0xfbf   :  { %v1914_v54 = vmul.f32 %v2224_v50, %v1913_v52 }
 0xfc1   :  { %v1915_v55 = vmul.f32 0.5, %v1914_v54 }
 0xfc3   :  { %v1916_v4 = vsub.f32 1.5, %v1915_v55 }
 0xfc5   :  { %v1917_v61 = vmul.f32 %v2224_v50, %v1916_v4 }
 0xfc7   :  { %v1921_v62 = vsel %vm1920_vm6, %v2224_v50, %v1917_v61 }
 0xfc8   :  { %v1923_v26 = vrot.slane %v1921_v62, 1  ;;  %v1926_v5 = vmul.f32 %v1921_v62, %v1898_v41 }
 0xfca   :  { %v1927_v0 = vmul.f32 %v1923_v26, %v1899_v42  ;;  %v1931_v10 = vmul.f32 %v2130_v3, %v1926_v5 }
 0xfcc   :  { %v1932_v6 = vmul.f32 %v2130_v3, %v1927_v0  ;;  %v1936_v8 = vadd.f32 %v2131_v56, %v1931_v10 }
 0xfce   :  { %v1937_v7 = vadd.f32 %v2131_v56, %v1932_v6 }
 0xfd0   :  { %v1948_v9 = vrot.slane %v1937_v7, 7 }
 0xfd2   :  { %v1949_v11 = vsel %vm1886_vm2, %v1948_v9, %v1936_v8 }
 0xfd3   :  { %2091 = vmatmul.msk.f32.vlgmr.msra.gmra.mxu1 %vm60_vm0, %v1949_v11 }
0x1050   :  { %v1969_v2 = vpop.f32.mrf.mxu1 }
0x1051   :  { %v1970_v12 = vadd.f32 %v2132_v22, %v1969_v2 }
0x1053   :  { %1973 = vst.msk [vmem:[#allocation2] sm:$0x3] %vm1972_vm7, %v1970_v12 }
0x1054   :  { %1984 = dma.vmem_to_hbm [thread:$0]  %s1980_s28, 32, %s1982_s16, [#allocation3]  }
0x1055   :  { %2249 = dma.done.wait [#allocation3], 32  }
0x1056   :  { %2250 = vsyncadd [#allocation3], 4294967264 }
0x1057   :  { %1989 = vsyncpa [#allocation3], 1 }

</bundles_post_ra>
